<compile_context>
chip_gen: v5e
topology: v5e:2x2
jax: 0.10.0
libtpu: 0.0.40
codegen_flags: <defaults>
</compile_context>

<pallas_src>
import functools

import jax
import jax.numpy as jnp
import numpy as np
from jax import lax
from jax.experimental import pallas as pl
from jax.experimental.pallas import tpu as pltpu

LANE = 128
SUB = 8


def _round_up(x, m):
    return (x + m - 1) // m * m


# ----------------------------------------------------------------------------
# Pallas kernel: the WHOLE TCN stack for one block of Bt batch elements.
# ----------------------------------------------------------------------------
def _tcn_fused_kernel(*refs, T, k, c_in0, layers, io_dtype):
    """refs = (x_ref, *weight refs, out_ref, a_scr, h_scr)."""
    n_w = sum(6 if L["has_ds"] else 4 for L in layers)
    x_ref = refs[0]
    w_refs = refs[1:1 + n_w]
    out_ref = refs[1 + n_w]
    a_scr = refs[2 + n_w]      # layer-input staging   (Bt, T+max_pf, max cin_p)
    h_scr = refs[3 + n_w]      # conv1-output staging  (Bt, T+max_pf, max cout_p)

    Bt = x_ref.shape[0]
    M = Bt * T

    def conv(src_ref, pf, p, d, cin, reg_last, w_ref, b_ref):
        # Causal dilated conv as ONE MXU matmul: the k dilated taps are
        # concatenated on the lane axis (contraction K = k*cin) and multiplied
        # by the tap-stacked weight (k*cin, cout).  The unshifted tap (j=k-1)
        # is taken from registers when available instead of a VMEM re-load.
        p_extra = pf - p                     # 8-alignment slack before the zeros
        taps = []
        for j in range(k):
            if j == k - 1 and reg_last is not None:
                taps.append(reg_last)
            else:
                t0 = p_extra + j * d
                taps.append(src_ref[:, t0:t0 + T, 0:cin].reshape(M, cin))
        a = taps[0] if k == 1 else jnp.concatenate(taps, axis=-1)
        y = jnp.dot(a, w_ref[...], preferred_element_type=jnp.float32) + b_ref[...]
        return jnp.maximum(y, 0.0)           # ReLU (dropout == identity, eval mode)

    h = None                                 # previous layer output, (M, cin_p)
    wi = 0
    for li, L in enumerate(layers):
        d, p, pf = L["d"], L["p"], L["pf"]
        cin, cout = L["cin_p"], L["cout_p"]
        w1_ref, b1_ref, w2_ref, b2_ref = w_refs[wi:wi + 4]
        wi += 4
        wd_ref = bd_ref = None
        if L["has_ds"]:
            wd_ref, bd_ref = w_refs[wi:wi + 2]
            wi += 2

        # ---- stage causally left-padded layer input (scratch reused per layer)
        if pf > 0:
            a_scr[:, 0:pf, 0:cin] = jnp.zeros((Bt, pf, cin), a_scr.dtype)
            h_scr[:, 0:pf, 0:cout] = jnp.zeros((Bt, pf, cout), h_scr.dtype)
        if li == 0:
            # un-padded x straight from its HBM block; zero-fill the lane tail
            a_scr[:, pf:pf + T, 0:c_in0] = x_ref[...].astype(a_scr.dtype)
            if cin > c_in0:
                a_scr[:, pf:pf + T, c_in0:cin] = jnp.zeros(
                    (Bt, T, cin - c_in0), a_scr.dtype)
        else:
            a_scr[:, pf:pf + T, 0:cin] = h.reshape(Bt, T, cin)

        # ---- conv1 -> ReLU (h's live range ends here; chomp is implicit) ----
        h1 = conv(a_scr, pf, p, d, cin, h, w1_ref, b1_ref).astype(io_dtype)
        h_scr[:, pf:pf + T, 0:cout] = h1.reshape(Bt, T, cout)

        # ---- conv2 -> ReLU ---------------------------------------------------
        out = conv(h_scr, pf, p, d, cout, h1, w2_ref, b2_ref)

        # ---- residual: re-read the staged layer input (low vreg pressure) ----
        res_in = a_scr[:, pf:pf + T, 0:cin].reshape(M, cin)
        if L["has_ds"]:
            res = jnp.dot(res_in, wd_ref[...],
                          preferred_element_type=jnp.float32) + bd_ref[...]
        else:
            res = res_in.astype(jnp.float32)

        h = jnp.maximum(out + res, 0.0).astype(io_dtype)

    out_ref[...] = h.reshape(Bt, T, out_ref.shape[-1]).astype(out_ref.dtype)


# ----------------------------------------------------------------------------
# Wrapper: whole network in one pallas_call, grid over batch blocks.
# ----------------------------------------------------------------------------
def tcn_forward(x, params, kernel_size, *, return_padded=False):
    """Equivalent of TemporalConvNet.forward.  x: (B, T, num_inputs)."""
    B, T, c_in0 = x.shape
    k = kernel_size
    io_dtype = x.dtype
    itemsize = jnp.dtype(io_dtype).itemsize

    # ---- lane-dense, tap-stacked weights ------------------------------------
    def stack_taps(w_kio):                        # (k, cin, cout) -> (k*cin_p, cout_p)
        kk, ci, co = w_kio.shape
        ci_p, co_p = _round_up(ci, LANE), _round_up(co, LANE)
        w_pad = jnp.pad(w_kio, ((0, 0), (0, ci_p - ci), (0, co_p - co)))
        return w_pad.reshape(kk * ci_p, co_p).astype(io_dtype)

    def pad_bias(b):                              # (cout,) -> (1, cout_p) f32
        co = b.shape[0]
        return jnp.pad(b.reshape(1, co),
                       ((0, 0), (0, _round_up(co, LANE) - co))).astype(jnp.float32)

    layers, w_args = [], []
    prev_c, prev_cp = c_in0, _round_up(c_in0, LANE)
    for lp in params:
        c_out = lp["w1"].shape[-1]
        cout_p = _round_up(c_out, LANE)
        d = lp["dilation"]
        p = (k - 1) * d
        pf = _round_up(p, SUB)                    # sublane-aligned staging offset
        has_ds = lp["wd"] is not None

        w_args += [stack_taps(lp["w1"]), pad_bias(lp["b1"]),
                   stack_taps(lp["w2"]), pad_bias(lp["b2"])]
        if has_ds:
            wd = jnp.pad(lp["wd"], ((0, prev_cp - prev_c),
                                    (0, cout_p - c_out))).astype(io_dtype)
            w_args += [wd, pad_bias(lp["bd"])]

        layers.append(dict(d=d, p=p, pf=pf, cin_p=prev_cp, cout_p=cout_p,
                           has_ds=has_ds))
        prev_c, prev_cp = c_out, cout_p

    c_last, cout_last_p = prev_c, prev_cp
    max_pf = max(L["pf"] for L in layers)
    a_cols = max(L["cin_p"] for L in layers)
    h_cols = max(L["cout_p"] for L in layers)
    wbytes = sum(int(np.prod(w.shape)) * w.dtype.itemsize for w in w_args)

    # ---- generation-aware VMEM budget + batch blocking ----------------------
    try:
        vmem_cap = int(pltpu.get_tpu_info().vmem_capacity_bytes)
    except Exception:
        vmem_cap = 64 * 2 ** 20                   # conservative (v7x-safe) fallback
    vmem_budget = int(0.85 * vmem_cap)            # headroom for internal scratch

    def vmem_est(bt):
        io_blk = 2 * bt * T * (c_in0 + cout_last_p) * itemsize   # dbl-buffered x/out
        scr = bt * (T + max_pf) * (a_cols + h_cols) * itemsize   # ping-pong staging
        return io_blk + wbytes + scr + (1 << 20)

    rows_cap = 512 if vmem_cap >= 96 * 2 ** 20 else 256          # M = Bt*T target
    bt_cap = max(1, min(B, rows_cap // max(T, 1)))
    while bt_cap > 1 and vmem_est(bt_cap) > vmem_budget:
        bt_cap -= 1
    Bt = max(c for c in range(1, bt_cap + 1) if B % c == 0)      # prefer no batch pad
    if 2 * Bt <= bt_cap:                                         # but not at >2x M loss
        Bt = bt_cap
    B_pad = _round_up(B, Bt)
    x_in = x if B_pad == B else jnp.pad(x, ((0, B_pad - B), (0, 0), (0, 0)))

    vmem_limit = int(min(vmem_budget, max(32 * 2 ** 20, 2 * vmem_est(Bt))))

    flops = 0
    for L in layers:
        flops += 2 * B_pad * T * k * (L["cin_p"] + L["cout_p"]) * L["cout_p"]
        if L["has_ds"]:
            flops += 2 * B_pad * T * L["cin_p"] * L["cout_p"]
    bytes_accessed = B_pad * T * (c_in0 + cout_last_p) * itemsize + wbytes

    kernel = functools.partial(_tcn_fused_kernel, T=T, k=k, c_in0=c_in0,
                               layers=tuple(layers), io_dtype=io_dtype)

    def run(weight_pipeline_mode):
        in_specs = [pl.BlockSpec((Bt, T, c_in0), lambda b: (b, 0, 0))]
        for w in w_args:
            nd = w.ndim
            kw = ({} if weight_pipeline_mode is None
                  else dict(pipeline_mode=weight_pipeline_mode))
            in_specs.append(
                pl.BlockSpec(w.shape, (lambda b, nd=nd: (0,) * nd), **kw))
        out_spec = pl.BlockSpec((Bt, T, cout_last_p), lambda b: (b, 0, 0))
        scratch_shapes = [pltpu.VMEM((Bt, T + max_pf, a_cols), io_dtype),
                          pltpu.VMEM((Bt, T + max_pf, h_cols), io_dtype)]
        out = pl.pallas_call(
            kernel,
            out_shape=jax.ShapeDtypeStruct((B_pad, T, cout_last_p), io_dtype),
            grid_spec=pltpu.PrefetchScalarGridSpec(
                num_scalar_prefetch=0,
                grid=(B_pad // Bt,),
                in_specs=in_specs,
                out_specs=out_spec,
                scratch_shapes=scratch_shapes),
            compiler_params=pltpu.CompilerParams(
                dimension_semantics=("parallel",),
                vmem_limit_bytes=vmem_limit),
            cost_estimate=pl.CostEstimate(flops=int(flops), transcendentals=0,
                                          bytes_accessed=int(bytes_accessed)),
        )(x_in, *w_args)
        return jax.block_until_ready(out)

    try:
        # grid-invariant weights: single VMEM buffer (no double-buffering)
        out_p = run(pl.Buffered(1))
    except Exception:
        out_p = run(None)

    if return_padded:
        return out_p                               # (B_pad, T, cout_last_p), lane-dense
    return out_p[:B, :, :c_last]


# ----------------------------------------------------------------------------
# Deterministic parameter init (mirrors the module's shapes and weight_norm:
# w = g * v / ||v||, norm over (in, k) per output channel).
# ----------------------------------------------------------------------------
def init_params(key, num_inputs, num_channels, kernel_size):
    def wn_conv(kv, kg, kb, cin, cout, ks):
        v = 0.01 * jax.random.normal(kv, (cout, cin, ks), jnp.float32)
        g = jax.random.uniform(kg, (cout,), jnp.float32, 0.5, 1.5)
        norm = jnp.sqrt(jnp.sum(v * v, axis=(1, 2), keepdims=True)) + 1e-12
        w = g[:, None, None] * v / norm                     # (cout, cin, ks)
        bound = 1.0 / np.sqrt(cin * ks)
        b = jax.random.uniform(kb, (cout,), jnp.float32, -bound, bound)
        # repack to (ks, cin, cout) for the kernel's tap-stacked matmul form
        return jnp.transpose(w, (2, 1, 0)), b

    params = []
    for i, c_out in enumerate(num_channels):
        c_in = num_inputs if i == 0 else num_channels[i - 1]
        key, k1, k2, k3, k4, k5, k6, k7, k8 = jax.random.split(key, 9)
        w1, b1 = wn_conv(k1, k2, k3, c_in, c_out, kernel_size)
        w2, b2 = wn_conv(k4, k5, k6, c_out, c_out, kernel_size)
        if c_in != c_out:
            wd = 0.01 * jax.random.normal(k7, (c_out, c_in), jnp.float32)
            bound = 1.0 / np.sqrt(c_in)
            bd = jax.random.uniform(k8, (c_out,), jnp.float32, -bound, bound)
            wd_k = jnp.transpose(wd, (1, 0))                # (c_in, c_out)
        else:
            wd_k, bd = None, None
        params.append(dict(w1=w1, b1=b1, w2=w2, b2=b2,
                           wd=wd_k, bd=bd, dilation=2 ** i))
    return params


# ----------------------------------------------------------------------------
# Pure-JAX reference (lax.conv_general_dilated) for verification.
# ----------------------------------------------------------------------------
def reference_forward(x, params, kernel_size):
    h = jnp.transpose(x, (0, 2, 1))  # (B, C, T)  -- mirrors torch.permute
    for lp in params:
        d = lp["dilation"]
        p = (kernel_size - 1) * d
        T = h.shape[2]

        def conv(inp, w_kio, b):
            w_oik = jnp.transpose(w_kio, (2, 1, 0))         # (cout, cin, k)
            y = lax.conv_general_dilated(
                inp, w_oik, window_strides=(1,), padding=[(p, p)],
                rhs_dilation=(d,), dimension_numbers=("NCH", "OIH", "NCH"))
            y = y[:, :, :T]                                  # Chomp1d
            return y + b[None, :, None]

        y = jnp.maximum(conv(h, lp["w1"], lp["b1"]), 0.0)
        y = jnp.maximum(conv(y, lp["w2"], lp["b2"]), 0.0)
        if lp["wd"] is not None:
            res = jnp.einsum("bct,cd->bdt", h, lp["wd"]) + lp["bd"][None, :, None]
        else:
            res = h
        h = jnp.maximum(y + res, 0.0)
    return jnp.transpose(h, (0, 2, 1))


if __name__ == "__main__":
    key = jax.random.PRNGKey(0)

    def check(B, T, num_inputs, num_channels, kernel_size, key):
        kx, kp = jax.random.split(key)
        x = jax.random.normal(kx, (B, T, num_inputs), jnp.float32)
        params = init_params(kp, num_inputs, num_channels, kernel_size)
        out = jax.block_until_ready(tcn_forward(x, params, kernel_size))
        ref = jax.block_until_ready(reference_forward(x, params, kernel_size))
        np.testing.assert_allclose(np.asarray(out), np.asarray(ref),
                                   rtol=1e-3, atol=1e-3)
        assert out.shape == (B, T, num_channels[-1])

    k1, k2 = jax.random.split(key)
    # Small config: two TemporalBlocks, k=2, dilations 1 and 2, both downsampled.
    check(2, 16, 4, (8, 16), 2, k1)
    # Deeper config: k=3, dilations 1/2/4, an identity-residual block, and a
    # batch size that does not divide the batch tile (exercises batch padding).
    check(5, 128, 4, (8, 8, 16), 3, k2)
    print("KERNEL_OK")
</pallas_src>

<mosaic_0001>
module attributes {stable_mosaic.version = 11 : i64} {
  func.func @_tcn_fused_kernel(%arg0: i32, %arg1: memref<2x16x4xf32, #tpu.memory_space<vmem>>, %arg2: memref<256x128xf32, #tpu.memory_space<vmem>>, %arg3: memref<1x128xf32, #tpu.memory_space<vmem>>, %arg4: memref<256x128xf32, #tpu.memory_space<vmem>>, %arg5: memref<1x128xf32, #tpu.memory_space<vmem>>, %arg6: memref<128x128xf32, #tpu.memory_space<vmem>>, %arg7: memref<1x128xf32, #tpu.memory_space<vmem>>, %arg8: memref<256x128xf32, #tpu.memory_space<vmem>>, %arg9: memref<1x128xf32, #tpu.memory_space<vmem>>, %arg10: memref<256x128xf32, #tpu.memory_space<vmem>>, %arg11: memref<1x128xf32, #tpu.memory_space<vmem>>, %arg12: memref<128x128xf32, #tpu.memory_space<vmem>>, %arg13: memref<1x128xf32, #tpu.memory_space<vmem>>, %arg14: memref<2x16x128xf32, #tpu.memory_space<vmem>>, %arg15: memref<2x24x128xf32, #tpu.memory_space<vmem>>, %arg16: memref<2x24x128xf32, #tpu.memory_space<vmem>>) attributes {dimension_semantics = [#tpu.dimension_semantics<parallel>], iteration_bounds = array<i64: 1>, scalar_prefetch = 0 : i64, scratch_operands = 2 : i64, tpu.core_type = #tpu.core_type<tc>, window_params = [{transform_indices = @transform_0, window_bounds = array<i64: 2, 16, 4>}, {pipeline_mode = #tpu.pipeline_mode<synchronous>, transform_indices = @transform_1, window_bounds = array<i64: 256, 128>}, {pipeline_mode = #tpu.pipeline_mode<synchronous>, transform_indices = @transform_2, window_bounds = array<i64: 1, 128>}, {pipeline_mode = #tpu.pipeline_mode<synchronous>, transform_indices = @transform_3, window_bounds = array<i64: 256, 128>}, {pipeline_mode = #tpu.pipeline_mode<synchronous>, transform_indices = @transform_4, window_bounds = array<i64: 1, 128>}, {pipeline_mode = #tpu.pipeline_mode<synchronous>, transform_indices = @transform_5, window_bounds = array<i64: 128, 128>}, {pipeline_mode = #tpu.pipeline_mode<synchronous>, transform_indices = @transform_6, window_bounds = array<i64: 1, 128>}, {pipeline_mode = #tpu.pipeline_mode<synchronous>, transform_indices = @transform_7, window_bounds = array<i64: 256, 128>}, {pipeline_mode = #tpu.pipeline_mode<synchronous>, transform_indices = @transform_8, window_bounds = array<i64: 1, 128>}, {pipeline_mode = #tpu.pipeline_mode<synchronous>, transform_indices = @transform_9, window_bounds = array<i64: 256, 128>}, {pipeline_mode = #tpu.pipeline_mode<synchronous>, transform_indices = @transform_10, window_bounds = array<i64: 1, 128>}, {pipeline_mode = #tpu.pipeline_mode<synchronous>, transform_indices = @transform_11, window_bounds = array<i64: 128, 128>}, {pipeline_mode = #tpu.pipeline_mode<synchronous>, transform_indices = @transform_12, window_bounds = array<i64: 1, 128>}, {transform_indices = @transform_13, window_bounds = array<i64: 2, 16, 128>}]} {
    %cst = arith.constant 0.000000e+00 : f32
    %0 = vector.broadcast %cst : f32 to vector<2x8x128xf32>
    %c0 = arith.constant 0 : index
    %c0_0 = arith.constant 0 : index
    %c0_1 = arith.constant 0 : index
    %1 = vector.load %arg15[%c0, %c0_0, %c0_1] : memref<2x24x128xf32, #tpu.memory_space<vmem>>, vector<2x8x128xf32>
    tpu.vector_store %arg15[%c0, %c0_0, %c0_1], %0 {strides = array<i32>} : memref<2x24x128xf32, #tpu.memory_space<vmem>>, vector<2x8x128xf32>,
    %cst_2 = arith.constant 0.000000e+00 : f32
    %2 = vector.broadcast %cst_2 : f32 to vector<2x8x128xf32>
    %c0_3 = arith.constant 0 : index
    %c0_4 = arith.constant 0 : index
    %c0_5 = arith.constant 0 : index
    %3 = vector.load %arg16[%c0_3, %c0_4, %c0_5] : memref<2x24x128xf32, #tpu.memory_space<vmem>>, vector<2x8x128xf32>
    tpu.vector_store %arg16[%c0_3, %c0_4, %c0_5], %2 {strides = array<i32>} : memref<2x24x128xf32, #tpu.memory_space<vmem>>, vector<2x8x128xf32>,
    %c0_6 = arith.constant 0 : index
    %c0_7 = arith.constant 0 : index
    %c0_8 = arith.constant 0 : index
    %4 = vector.load %arg1[%c0_6, %c0_7, %c0_8] : memref<2x16x4xf32, #tpu.memory_space<vmem>>, vector<2x16x4xf32>
    %c0_9 = arith.constant 0 : index
    %c8 = arith.constant 8 : index
    %c0_10 = arith.constant 0 : index
    %5 = vector.load %arg15[%c0_9, %c8, %c0_10] : memref<2x24x128xf32, #tpu.memory_space<vmem>>, vector<2x16x4xf32>
    tpu.vector_store %arg15[%c0_9, %c8, %c0_10], %4 {strides = array<i32>} : memref<2x24x128xf32, #tpu.memory_space<vmem>>, vector<2x16x4xf32>,
    %cst_11 = arith.constant 0.000000e+00 : f32
    %6 = vector.broadcast %cst_11 : f32 to vector<2x16x124xf32>
    %c0_12 = arith.constant 0 : index
    %c8_13 = arith.constant 8 : index
    %c4 = arith.constant 4 : index
    %7 = vector.load %arg15[%c0_12, %c8_13, %c4] : memref<2x24x128xf32, #tpu.memory_space<vmem>>, vector<2x16x124xf32>
    tpu.vector_store %arg15[%c0_12, %c8_13, %c4], %6 {strides = array<i32>} : memref<2x24x128xf32, #tpu.memory_space<vmem>>, vector<2x16x124xf32>,
    %c0_14 = arith.constant 0 : index
    %c7 = arith.constant 7 : index
    %c0_15 = arith.constant 0 : index
    %8 = vector.load %arg15[%c0_14, %c7, %c0_15] : memref<2x24x128xf32, #tpu.memory_space<vmem>>, vector<2x16x128xf32>
    %9 = vector.shape_cast %8 : vector<2x16x128xf32> to vector<32x128xf32>
    %c0_16 = arith.constant 0 : index
    %c8_17 = arith.constant 8 : index
    %c0_18 = arith.constant 0 : index
    %10 = vector.load %arg15[%c0_16, %c8_17, %c0_18] : memref<2x24x128xf32, #tpu.memory_space<vmem>>, vector<2x16x128xf32>
    %11 = vector.shape_cast %10 : vector<2x16x128xf32> to vector<32x128xf32>
    %12 = tpu.concatenate %9, %11 in 1 : vector<32x128xf32>, vector<32x128xf32> -> vector<32x256xf32>
    %c0_19 = arith.constant 0 : index
    %c0_20 = arith.constant 0 : index
    %13 = vector.load %arg2[%c0_19, %c0_20] : memref<256x128xf32, #tpu.memory_space<vmem>>, vector<256x128xf32>
    %cst_21 = arith.constant dense<0.000000e+00> : vector<32x128xf32>
    %14 = tpu.matmul %12, %13, %cst_21 {dimension_numbers = #tpu.dot_dimension_numbers<[1], [0], [0], [1], [0, 0, 1, 1], [], []>} : vector<32x256xf32>, vector<256x128xf32>, vector<32x128xf32> -> vector<32x128xf32>
    %c0_22 = arith.constant 0 : index
    %c0_23 = arith.constant 0 : index
    %15 = vector.load %arg3[%c0_22, %c0_23] : memref<1x128xf32, #tpu.memory_space<vmem>>, vector<1x128xf32>
    %16 = vector.broadcast %15 : vector<1x128xf32> to vector<32x128xf32>
    %17 = arith.addf %14, %16 : vector<32x128xf32>
    %cst_24 = arith.constant 0.000000e+00 : f32
    %18 = vector.broadcast %cst_24 : f32 to vector<32x128xf32>
    %19 = arith.maximumf %17, %18 : vector<32x128xf32>
    %20 = vector.shape_cast %19 : vector<32x128xf32> to vector<2x16x128xf32>
    %c0_25 = arith.constant 0 : index
    %c8_26 = arith.constant 8 : index
    %c0_27 = arith.constant 0 : index
    %21 = vector.load %arg16[%c0_25, %c8_26, %c0_27] : memref<2x24x128xf32, #tpu.memory_space<vmem>>, vector<2x16x128xf32>
    tpu.vector_store %arg16[%c0_25, %c8_26, %c0_27], %20 {strides = array<i32>} : memref<2x24x128xf32, #tpu.memory_space<vmem>>, vector<2x16x128xf32>,
    %c0_28 = arith.constant 0 : index
    %c7_29 = arith.constant 7 : index
    %c0_30 = arith.constant 0 : index
    %22 = vector.load %arg16[%c0_28, %c7_29, %c0_30] : memref<2x24x128xf32, #tpu.memory_space<vmem>>, vector<2x16x128xf32>
    %23 = vector.shape_cast %22 : vector<2x16x128xf32> to vector<32x128xf32>
    %24 = tpu.concatenate %23, %19 in 1 : vector<32x128xf32>, vector<32x128xf32> -> vector<32x256xf32>
    %c0_31 = arith.constant 0 : index
    %c0_32 = arith.constant 0 : index
    %25 = vector.load %arg4[%c0_31, %c0_32] : memref<256x128xf32, #tpu.memory_space<vmem>>, vector<256x128xf32>
    %cst_33 = arith.constant dense<0.000000e+00> : vector<32x128xf32>
    %26 = tpu.matmul %24, %25, %cst_33 {dimension_numbers = #tpu.dot_dimension_numbers<[1], [0], [0], [1], [0, 0, 1, 1], [], []>} : vector<32x256xf32>, vector<256x128xf32>, vector<32x128xf32> -> vector<32x128xf32>
    %c0_34 = arith.constant 0 : index
    %c0_35 = arith.constant 0 : index
    %27 = vector.load %arg5[%c0_34, %c0_35] : memref<1x128xf32, #tpu.memory_space<vmem>>, vector<1x128xf32>
    %28 = vector.broadcast %27 : vector<1x128xf32> to vector<32x128xf32>
    %29 = arith.addf %26, %28 : vector<32x128xf32>
    %cst_36 = arith.constant 0.000000e+00 : f32
    %30 = vector.broadcast %cst_36 : f32 to vector<32x128xf32>
    %31 = arith.maximumf %29, %30 : vector<32x128xf32>
    %c0_37 = arith.constant 0 : index
    %c8_38 = arith.constant 8 : index
    %c0_39 = arith.constant 0 : index
    %32 = vector.load %arg15[%c0_37, %c8_38, %c0_39] : memref<2x24x128xf32, #tpu.memory_space<vmem>>, vector<2x16x128xf32>
    %33 = vector.shape_cast %32 : vector<2x16x128xf32> to vector<32x128xf32>
    %c0_40 = arith.constant 0 : index
    %c0_41 = arith.constant 0 : index
    %34 = vector.load %arg6[%c0_40, %c0_41] : memref<128x128xf32, #tpu.memory_space<vmem>>, vector<128x128xf32>
    %cst_42 = arith.constant dense<0.000000e+00> : vector<32x128xf32>
    %35 = tpu.matmul %33, %34, %cst_42 {dimension_numbers = #tpu.dot_dimension_numbers<[1], [0], [0], [1], [0, 0, 1, 1], [], []>} : vector<32x128xf32>, vector<128x128xf32>, vector<32x128xf32> -> vector<32x128xf32>
    %c0_43 = arith.constant 0 : index
    %c0_44 = arith.constant 0 : index
    %36 = vector.load %arg7[%c0_43, %c0_44] : memref<1x128xf32, #tpu.memory_space<vmem>>, vector<1x128xf32>
    %37 = vector.broadcast %36 : vector<1x128xf32> to vector<32x128xf32>
    %38 = arith.addf %35, %37 : vector<32x128xf32>
    %39 = arith.addf %31, %38 : vector<32x128xf32>
    %cst_45 = arith.constant 0.000000e+00 : f32
    %40 = vector.broadcast %cst_45 : f32 to vector<32x128xf32>
    %41 = arith.maximumf %39, %40 : vector<32x128xf32>
    %cst_46 = arith.constant 0.000000e+00 : f32
    %42 = vector.broadcast %cst_46 : f32 to vector<2x8x128xf32>
    %c0_47 = arith.constant 0 : index
    %c0_48 = arith.constant 0 : index
    %c0_49 = arith.constant 0 : index
    %43 = vector.load %arg15[%c0_47, %c0_48, %c0_49] : memref<2x24x128xf32, #tpu.memory_space<vmem>>, vector<2x8x128xf32>
    tpu.vector_store %arg15[%c0_47, %c0_48, %c0_49], %42 {strides = array<i32>} : memref<2x24x128xf32, #tpu.memory_space<vmem>>, vector<2x8x128xf32>,
    %cst_50 = arith.constant 0.000000e+00 : f32
    %44 = vector.broadcast %cst_50 : f32 to vector<2x8x128xf32>
    %c0_51 = arith.constant 0 : index
    %c0_52 = arith.constant 0 : index
    %c0_53 = arith.constant 0 : index
    %45 = vector.load %arg16[%c0_51, %c0_52, %c0_53] : memref<2x24x128xf32, #tpu.memory_space<vmem>>, vector<2x8x128xf32>
    tpu.vector_store %arg16[%c0_51, %c0_52, %c0_53], %44 {strides = array<i32>} : memref<2x24x128xf32, #tpu.memory_space<vmem>>, vector<2x8x128xf32>,
    %46 = vector.shape_cast %41 : vector<32x128xf32> to vector<2x16x128xf32>
    %c0_54 = arith.constant 0 : index
    %c8_55 = arith.constant 8 : index
    %c0_56 = arith.constant 0 : index
    %47 = vector.load %arg15[%c0_54, %c8_55, %c0_56] : memref<2x24x128xf32, #tpu.memory_space<vmem>>, vector<2x16x128xf32>
    tpu.vector_store %arg15[%c0_54, %c8_55, %c0_56], %46 {strides = array<i32>} : memref<2x24x128xf32, #tpu.memory_space<vmem>>, vector<2x16x128xf32>,
    %c0_57 = arith.constant 0 : index
    %c6 = arith.constant 6 : index
    %c0_58 = arith.constant 0 : index
    %48 = vector.load %arg15[%c0_57, %c6, %c0_58] : memref<2x24x128xf32, #tpu.memory_space<vmem>>, vector<2x16x128xf32>
    %49 = vector.shape_cast %48 : vector<2x16x128xf32> to vector<32x128xf32>
    %50 = tpu.concatenate %49, %41 in 1 : vector<32x128xf32>, vector<32x128xf32> -> vector<32x256xf32>
    %c0_59 = arith.constant 0 : index
    %c0_60 = arith.constant 0 : index
    %51 = vector.load %arg8[%c0_59, %c0_60] : memref<256x128xf32, #tpu.memory_space<vmem>>, vector<256x128xf32>
    %cst_61 = arith.constant dense<0.000000e+00> : vector<32x128xf32>
    %52 = tpu.matmul %50, %51, %cst_61 {dimension_numbers = #tpu.dot_dimension_numbers<[1], [0], [0], [1], [0, 0, 1, 1], [], []>} : vector<32x256xf32>, vector<256x128xf32>, vector<32x128xf32> -> vector<32x128xf32>
    %c0_62 = arith.constant 0 : index
    %c0_63 = arith.constant 0 : index
    %53 = vector.load %arg9[%c0_62, %c0_63] : memref<1x128xf32, #tpu.memory_space<vmem>>, vector<1x128xf32>
    %54 = vector.broadcast %53 : vector<1x128xf32> to vector<32x128xf32>
    %55 = arith.addf %52, %54 : vector<32x128xf32>
    %cst_64 = arith.constant 0.000000e+00 : f32
    %56 = vector.broadcast %cst_64 : f32 to vector<32x128xf32>
    %57 = arith.maximumf %55, %56 : vector<32x128xf32>
    %58 = vector.shape_cast %57 : vector<32x128xf32> to vector<2x16x128xf32>
    %c0_65 = arith.constant 0 : index
    %c8_66 = arith.constant 8 : index
    %c0_67 = arith.constant 0 : index
    %59 = vector.load %arg16[%c0_65, %c8_66, %c0_67] : memref<2x24x128xf32, #tpu.memory_space<vmem>>, vector<2x16x128xf32>
    tpu.vector_store %arg16[%c0_65, %c8_66, %c0_67], %58 {strides = array<i32>} : memref<2x24x128xf32, #tpu.memory_space<vmem>>, vector<2x16x128xf32>,
    %c0_68 = arith.constant 0 : index
    %c6_69 = arith.constant 6 : index
    %c0_70 = arith.constant 0 : index
    %60 = vector.load %arg16[%c0_68, %c6_69, %c0_70] : memref<2x24x128xf32, #tpu.memory_space<vmem>>, vector<2x16x128xf32>
    %61 = vector.shape_cast %60 : vector<2x16x128xf32> to vector<32x128xf32>
    %62 = tpu.concatenate %61, %57 in 1 : vector<32x128xf32>, vector<32x128xf32> -> vector<32x256xf32>
    %c0_71 = arith.constant 0 : index
    %c0_72 = arith.constant 0 : index
    %63 = vector.load %arg10[%c0_71, %c0_72] : memref<256x128xf32, #tpu.memory_space<vmem>>, vector<256x128xf32>
    %cst_73 = arith.constant dense<0.000000e+00> : vector<32x128xf32>
    %64 = tpu.matmul %62, %63, %cst_73 {dimension_numbers = #tpu.dot_dimension_numbers<[1], [0], [0], [1], [0, 0, 1, 1], [], []>} : vector<32x256xf32>, vector<256x128xf32>, vector<32x128xf32> -> vector<32x128xf32>
    %c0_74 = arith.constant 0 : index
    %c0_75 = arith.constant 0 : index
    %65 = vector.load %arg11[%c0_74, %c0_75] : memref<1x128xf32, #tpu.memory_space<vmem>>, vector<1x128xf32>
    %66 = vector.broadcast %65 : vector<1x128xf32> to vector<32x128xf32>
    %67 = arith.addf %64, %66 : vector<32x128xf32>
    %cst_76 = arith.constant 0.000000e+00 : f32
    %68 = vector.broadcast %cst_76 : f32 to vector<32x128xf32>
    %69 = arith.maximumf %67, %68 : vector<32x128xf32>
    %c0_77 = arith.constant 0 : index
    %c8_78 = arith.constant 8 : index
    %c0_79 = arith.constant 0 : index
    %70 = vector.load %arg15[%c0_77, %c8_78, %c0_79] : memref<2x24x128xf32, #tpu.memory_space<vmem>>, vector<2x16x128xf32>
    %71 = vector.shape_cast %70 : vector<2x16x128xf32> to vector<32x128xf32>
    %c0_80 = arith.constant 0 : index
    %c0_81 = arith.constant 0 : index
    %72 = vector.load %arg12[%c0_80, %c0_81] : memref<128x128xf32, #tpu.memory_space<vmem>>, vector<128x128xf32>
    %cst_82 = arith.constant dense<0.000000e+00> : vector<32x128xf32>
    %73 = tpu.matmul %71, %72, %cst_82 {dimension_numbers = #tpu.dot_dimension_numbers<[1], [0], [0], [1], [0, 0, 1, 1], [], []>} : vector<32x128xf32>, vector<128x128xf32>, vector<32x128xf32> -> vector<32x128xf32>
    %c0_83 = arith.constant 0 : index
    %c0_84 = arith.constant 0 : index
    %74 = vector.load %arg13[%c0_83, %c0_84] : memref<1x128xf32, #tpu.memory_space<vmem>>, vector<1x128xf32>
    %75 = vector.broadcast %74 : vector<1x128xf32> to vector<32x128xf32>
    %76 = arith.addf %73, %75 : vector<32x128xf32>
    %77 = arith.addf %69, %76 : vector<32x128xf32>
    %cst_85 = arith.constant 0.000000e+00 : f32
    %78 = vector.broadcast %cst_85 : f32 to vector<32x128xf32>
    %79 = arith.maximumf %77, %78 : vector<32x128xf32>
    %80 = vector.shape_cast %79 : vector<32x128xf32> to vector<2x16x128xf32>
    %c0_86 = arith.constant 0 : index
    %c0_87 = arith.constant 0 : index
    %c0_88 = arith.constant 0 : index
    %81 = vector.load %arg14[%c0_86, %c0_87, %c0_88] : memref<2x16x128xf32, #tpu.memory_space<vmem>>, vector<2x16x128xf32>
    tpu.vector_store %arg14[%c0_86, %c0_87, %c0_88], %80 {strides = array<i32>} : memref<2x16x128xf32, #tpu.memory_space<vmem>>, vector<2x16x128xf32>,
    return
  }
  func.func @transform_0(%arg0: i32) -> (i32, i32, i32) {
    %c0_i32 = arith.constant 0 : i32
    %c0_i32_0 = arith.constant 0 : i32
    %c0_i32_1 = arith.constant 0 : i32
    return %arg0, %c0_i32, %c0_i32_0 : i32, i32, i32
  }
  func.func @transform_1(%arg0: i32) -> (i32, i32) {
    %c0_i32 = arith.constant 0 : i32
    %c0_i32_0 = arith.constant 0 : i32
    %c0_i32_1 = arith.constant 0 : i32
    return %c0_i32, %c0_i32_0 : i32, i32
  }
  func.func @transform_2(%arg0: i32) -> (i32, i32) {
    %c0_i32 = arith.constant 0 : i32
    %c0_i32_0 = arith.constant 0 : i32
    %c0_i32_1 = arith.constant 0 : i32
    return %c0_i32, %c0_i32_0 : i32, i32
  }
  func.func @transform_3(%arg0: i32) -> (i32, i32) {
    %c0_i32 = arith.constant 0 : i32
    %c0_i32_0 = arith.constant 0 : i32
    %c0_i32_1 = arith.constant 0 : i32
    return %c0_i32, %c0_i32_0 : i32, i32
  }
  func.func @transform_4(%arg0: i32) -> (i32, i32) {
    %c0_i32 = arith.constant 0 : i32
    %c0_i32_0 = arith.constant 0 : i32
    %c0_i32_1 = arith.constant 0 : i32
    return %c0_i32, %c0_i32_0 : i32, i32
  }
  func.func @transform_5(%arg0: i32) -> (i32, i32) {
    %c0_i32 = arith.constant 0 : i32
    %c0_i32_0 = arith.constant 0 : i32
    %c0_i32_1 = arith.constant 0 : i32
    return %c0_i32, %c0_i32_0 : i32, i32
  }
  func.func @transform_6(%arg0: i32) -> (i32, i32) {
    %c0_i32 = arith.constant 0 : i32
    %c0_i32_0 = arith.constant 0 : i32
    %c0_i32_1 = arith.constant 0 : i32
    return %c0_i32, %c0_i32_0 : i32, i32
  }
  func.func @transform_7(%arg0: i32) -> (i32, i32) {
    %c0_i32 = arith.constant 0 : i32
    %c0_i32_0 = arith.constant 0 : i32
    %c0_i32_1 = arith.constant 0 : i32
    return %c0_i32, %c0_i32_0 : i32, i32
  }
  func.func @transform_8(%arg0: i32) -> (i32, i32) {
    %c0_i32 = arith.constant 0 : i32
    %c0_i32_0 = arith.constant 0 : i32
    %c0_i32_1 = arith.constant 0 : i32
    return %c0_i32, %c0_i32_0 : i32, i32
  }
  func.func @transform_9(%arg0: i32) -> (i32, i32) {
    %c0_i32 = arith.constant 0 : i32
    %c0_i32_0 = arith.constant 0 : i32
    %c0_i32_1 = arith.constant 0 : i32
    return %c0_i32, %c0_i32_0 : i32, i32
  }
  func.func @transform_10(%arg0: i32) -> (i32, i32) {
    %c0_i32 = arith.constant 0 : i32
    %c0_i32_0 = arith.constant 0 : i32
    %c0_i32_1 = arith.constant 0 : i32
    return %c0_i32, %c0_i32_0 : i32, i32
  }
  func.func @transform_11(%arg0: i32) -> (i32, i32) {
    %c0_i32 = arith.constant 0 : i32
    %c0_i32_0 = arith.constant 0 : i32
    %c0_i32_1 = arith.constant 0 : i32
    return %c0_i32, %c0_i32_0 : i32, i32
  }
  func.func @transform_12(%arg0: i32) -> (i32, i32) {
    %c0_i32 = arith.constant 0 : i32
    %c0_i32_0 = arith.constant 0 : i32
    %c0_i32_1 = arith.constant 0 : i32
    return %c0_i32, %c0_i32_0 : i32, i32
  }
  func.func @transform_13(%arg0: i32) -> (i32, i32, i32) {
    %c0_i32 = arith.constant 0 : i32
    %c0_i32_0 = arith.constant 0 : i32
    %c0_i32_1 = arith.constant 0 : i32
    return %arg0, %c0_i32, %c0_i32_0 : i32, i32, i32
  }
}

module attributes {stable_mosaic.version = 11 : i64} {
  func.func @_tcn_fused_kernel(%arg0: i32, %arg1: memref<2x16x4xf32, #tpu.memory_space<vmem>>, %arg2: memref<256x128xf32, #tpu.memory_space<vmem>>, %arg3: memref<1x128xf32, #tpu.memory_space<vmem>>, %arg4: memref<256x128xf32, #tpu.memory_space<vmem>>, %arg5: memref<1x128xf32, #tpu.memory_space<vmem>>, %arg6: memref<128x128xf32, #tpu.memory_space<vmem>>, %arg7: memref<1x128xf32, #tpu.memory_space<vmem>>, %arg8: memref<256x128xf32, #tpu.memory_space<vmem>>, %arg9: memref<1x128xf32, #tpu.memory_space<vmem>>, %arg10: memref<256x128xf32, #tpu.memory_space<vmem>>, %arg11: memref<1x128xf32, #tpu.memory_space<vmem>>, %arg12: memref<128x128xf32, #tpu.memory_space<vmem>>, %arg13: memref<1x128xf32, #tpu.memory_space<vmem>>, %arg14: memref<2x16x128xf32, #tpu.memory_space<vmem>>, %arg15: memref<2x24x128xf32, #tpu.memory_space<vmem>>, %arg16: memref<2x24x128xf32, #tpu.memory_space<vmem>>) attributes {dimension_semantics = [#tpu.dimension_semantics<parallel>], iteration_bounds = array<i64: 1>, scalar_prefetch = 0 : i64, scratch_operands = 2 : i64, tpu.core_type = #tpu.core_type<tc>, window_params = [{transform_indices = @transform_0, window_bounds = array<i64: 2, 16, 4>}, {pipeline_mode = #tpu.pipeline_mode<synchronous>, transform_indices = @transform_1, window_bounds = array<i64: 256, 128>}, {pipeline_mode = #tpu.pipeline_mode<synchronous>, transform_indices = @transform_2, window_bounds = array<i64: 1, 128>}, {pipeline_mode = #tpu.pipeline_mode<synchronous>, transform_indices = @transform_3, window_bounds = array<i64: 256, 128>}, {pipeline_mode = #tpu.pipeline_mode<synchronous>, transform_indices = @transform_4, window_bounds = array<i64: 1, 128>}, {pipeline_mode = #tpu.pipeline_mode<synchronous>, transform_indices = @transform_5, window_bounds = array<i64: 128, 128>}, {pipeline_mode = #tpu.pipeline_mode<synchronous>, transform_indices = @transform_6, window_bounds = array<i64: 1, 128>}, {pipeline_mode = #tpu.pipeline_mode<synchronous>, transform_indices = @transform_7, window_bounds = array<i64: 256, 128>}, {pipeline_mode = #tpu.pipeline_mode<synchronous>, transform_indices = @transform_8, window_bounds = array<i64: 1, 128>}, {pipeline_mode = #tpu.pipeline_mode<synchronous>, transform_indices = @transform_9, window_bounds = array<i64: 256, 128>}, {pipeline_mode = #tpu.pipeline_mode<synchronous>, transform_indices = @transform_10, window_bounds = array<i64: 1, 128>}, {pipeline_mode = #tpu.pipeline_mode<synchronous>, transform_indices = @transform_11, window_bounds = array<i64: 128, 128>}, {pipeline_mode = #tpu.pipeline_mode<synchronous>, transform_indices = @transform_12, window_bounds = array<i64: 1, 128>}, {transform_indices = @transform_13, window_bounds = array<i64: 2, 16, 128>}]} {
    %cst = arith.constant 0.000000e+00 : f32
    %0 = vector.broadcast %cst : f32 to vector<2x8x128xf32>
    %c0 = arith.constant 0 : index
    %c0_0 = arith.constant 0 : index
    %c0_1 = arith.constant 0 : index
    %1 = vector.load %arg15[%c0, %c0_0, %c0_1] : memref<2x24x128xf32, #tpu.memory_space<vmem>>, vector<2x8x128xf32>
    tpu.vector_store %arg15[%c0, %c0_0, %c0_1], %0 {strides = array<i32>} : memref<2x24x128xf32, #tpu.memory_space<vmem>>, vector<2x8x128xf32>,
    %cst_2 = arith.constant 0.000000e+00 : f32
    %2 = vector.broadcast %cst_2 : f32 to vector<2x8x128xf32>
    %c0_3 = arith.constant 0 : index
    %c0_4 = arith.constant 0 : index
    %c0_5 = arith.constant 0 : index
    %3 = vector.load %arg16[%c0_3, %c0_4, %c0_5] : memref<2x24x128xf32, #tpu.memory_space<vmem>>, vector<2x8x128xf32>
    tpu.vector_store %arg16[%c0_3, %c0_4, %c0_5], %2 {strides = array<i32>} : memref<2x24x128xf32, #tpu.memory_space<vmem>>, vector<2x8x128xf32>,
    %c0_6 = arith.constant 0 : index
    %c0_7 = arith.constant 0 : index
    %c0_8 = arith.constant 0 : index
    %4 = vector.load %arg1[%c0_6, %c0_7, %c0_8] : memref<2x16x4xf32, #tpu.memory_space<vmem>>, vector<2x16x4xf32>
    %c0_9 = arith.constant 0 : index
    %c8 = arith.constant 8 : index
    %c0_10 = arith.constant 0 : index
    %5 = vector.load %arg15[%c0_9, %c8, %c0_10] : memref<2x24x128xf32, #tpu.memory_space<vmem>>, vector<2x16x4xf32>
    tpu.vector_store %arg15[%c0_9, %c8, %c0_10], %4 {strides = array<i32>} : memref<2x24x128xf32, #tpu.memory_space<vmem>>, vector<2x16x4xf32>,
    %cst_11 = arith.constant 0.000000e+00 : f32
    %6 = vector.broadcast %cst_11 : f32 to vector<2x16x124xf32>
    %c0_12 = arith.constant 0 : index
    %c8_13 = arith.constant 8 : index
    %c4 = arith.constant 4 : index
    %7 = vector.load %arg15[%c0_12, %c8_13, %c4] : memref<2x24x128xf32, #tpu.memory_space<vmem>>, vector<2x16x124xf32>
    tpu.vector_store %arg15[%c0_12, %c8_13, %c4], %6 {strides = array<i32>} : memref<2x24x128xf32, #tpu.memory_space<vmem>>, vector<2x16x124xf32>,
    %c0_14 = arith.constant 0 : index
    %c7 = arith.constant 7 : index
    %c0_15 = arith.constant 0 : index
    %8 = vector.load %arg15[%c0_14, %c7, %c0_15] : memref<2x24x128xf32, #tpu.memory_space<vmem>>, vector<2x16x128xf32>
    %9 = vector.shape_cast %8 : vector<2x16x128xf32> to vector<32x128xf32>
    %c0_16 = arith.constant 0 : index
    %c8_17 = arith.constant 8 : index
    %c0_18 = arith.constant 0 : index
    %10 = vector.load %arg15[%c0_16, %c8_17, %c0_18] : memref<2x24x128xf32, #tpu.memory_space<vmem>>, vector<2x16x128xf32>
    %11 = vector.shape_cast %10 : vector<2x16x128xf32> to vector<32x128xf32>
    %12 = tpu.concatenate %9, %11 in 1 : vector<32x128xf32>, vector<32x128xf32> -> vector<32x256xf32>
    %c0_19 = arith.constant 0 : index
    %c0_20 = arith.constant 0 : index
    %13 = vector.load %arg2[%c0_19, %c0_20] : memref<256x128xf32, #tpu.memory_space<vmem>>, vector<256x128xf32>
    %cst_21 = arith.constant dense<0.000000e+00> : vector<32x128xf32>
    %14 = tpu.matmul %12, %13, %cst_21 {dimension_numbers = #tpu.dot_dimension_numbers<[1], [0], [0], [1], [0, 0, 1, 1], [], []>} : vector<32x256xf32>, vector<256x128xf32>, vector<32x128xf32> -> vector<32x128xf32>
    %c0_22 = arith.constant 0 : index
    %c0_23 = arith.constant 0 : index
    %15 = vector.load %arg3[%c0_22, %c0_23] : memref<1x128xf32, #tpu.memory_space<vmem>>, vector<1x128xf32>
    %16 = vector.broadcast %15 : vector<1x128xf32> to vector<32x128xf32>
    %17 = arith.addf %14, %16 : vector<32x128xf32>
    %cst_24 = arith.constant 0.000000e+00 : f32
    %18 = vector.broadcast %cst_24 : f32 to vector<32x128xf32>
    %19 = arith.maximumf %17, %18 : vector<32x128xf32>
    %20 = vector.shape_cast %19 : vector<32x128xf32> to vector<2x16x128xf32>
    %c0_25 = arith.constant 0 : index
    %c8_26 = arith.constant 8 : index
    %c0_27 = arith.constant 0 : index
    %21 = vector.load %arg16[%c0_25, %c8_26, %c0_27] : memref<2x24x128xf32, #tpu.memory_space<vmem>>, vector<2x16x128xf32>
    tpu.vector_store %arg16[%c0_25, %c8_26, %c0_27], %20 {strides = array<i32>} : memref<2x24x128xf32, #tpu.memory_space<vmem>>, vector<2x16x128xf32>,
    %c0_28 = arith.constant 0 : index
    %c7_29 = arith.constant 7 : index
    %c0_30 = arith.constant 0 : index
    %22 = vector.load %arg16[%c0_28, %c7_29, %c0_30] : memref<2x24x128xf32, #tpu.memory_space<vmem>>, vector<2x16x128xf32>
    %23 = vector.shape_cast %22 : vector<2x16x128xf32> to vector<32x128xf32>
    %24 = tpu.concatenate %23, %19 in 1 : vector<32x128xf32>, vector<32x128xf32> -> vector<32x256xf32>
    %c0_31 = arith.constant 0 : index
    %c0_32 = arith.constant 0 : index
    %25 = vector.load %arg4[%c0_31, %c0_32] : memref<256x128xf32, #tpu.memory_space<vmem>>, vector<256x128xf32>
    %cst_33 = arith.constant dense<0.000000e+00> : vector<32x128xf32>
    %26 = tpu.matmul %24, %25, %cst_33 {dimension_numbers = #tpu.dot_dimension_numbers<[1], [0], [0], [1], [0, 0, 1, 1], [], []>} : vector<32x256xf32>, vector<256x128xf32>, vector<32x128xf32> -> vector<32x128xf32>
    %c0_34 = arith.constant 0 : index
    %c0_35 = arith.constant 0 : index
    %27 = vector.load %arg5[%c0_34, %c0_35] : memref<1x128xf32, #tpu.memory_space<vmem>>, vector<1x128xf32>
    %28 = vector.broadcast %27 : vector<1x128xf32> to vector<32x128xf32>
    %29 = arith.addf %26, %28 : vector<32x128xf32>
    %cst_36 = arith.constant 0.000000e+00 : f32
    %30 = vector.broadcast %cst_36 : f32 to vector<32x128xf32>
    %31 = arith.maximumf %29, %30 : vector<32x128xf32>
    %c0_37 = arith.constant 0 : index
    %c8_38 = arith.constant 8 : index
    %c0_39 = arith.constant 0 : index
    %32 = vector.load %arg15[%c0_37, %c8_38, %c0_39] : memref<2x24x128xf32, #tpu.memory_space<vmem>>, vector<2x16x128xf32>
    %33 = vector.shape_cast %32 : vector<2x16x128xf32> to vector<32x128xf32>
    %c0_40 = arith.constant 0 : index
    %c0_41 = arith.constant 0 : index
    %34 = vector.load %arg6[%c0_40, %c0_41] : memref<128x128xf32, #tpu.memory_space<vmem>>, vector<128x128xf32>
    %cst_42 = arith.constant dense<0.000000e+00> : vector<32x128xf32>
    %35 = tpu.matmul %33, %34, %cst_42 {dimension_numbers = #tpu.dot_dimension_numbers<[1], [0], [0], [1], [0, 0, 1, 1], [], []>} : vector<32x128xf32>, vector<128x128xf32>, vector<32x128xf32> -> vector<32x128xf32>
    %c0_43 = arith.constant 0 : index
    %c0_44 = arith.constant 0 : index
    %36 = vector.load %arg7[%c0_43, %c0_44] : memref<1x128xf32, #tpu.memory_space<vmem>>, vector<1x128xf32>
    %37 = vector.broadcast %36 : vector<1x128xf32> to vector<32x128xf32>
    %38 = arith.addf %35, %37 : vector<32x128xf32>
    %39 = arith.addf %31, %38 : vector<32x128xf32>
    %cst_45 = arith.constant 0.000000e+00 : f32
    %40 = vector.broadcast %cst_45 : f32 to vector<32x128xf32>
    %41 = arith.maximumf %39, %40 : vector<32x128xf32>
    %cst_46 = arith.constant 0.000000e+00 : f32
    %42 = vector.broadcast %cst_46 : f32 to vector<2x8x128xf32>
    %c0_47 = arith.constant 0 : index
    %c0_48 = arith.constant 0 : index
    %c0_49 = arith.constant 0 : index
    %43 = vector.load %arg15[%c0_47, %c0_48, %c0_49] : memref<2x24x128xf32, #tpu.memory_space<vmem>>, vector<2x8x128xf32>
    tpu.vector_store %arg15[%c0_47, %c0_48, %c0_49], %42 {strides = array<i32>} : memref<2x24x128xf32, #tpu.memory_space<vmem>>, vector<2x8x128xf32>,
    %cst_50 = arith.constant 0.000000e+00 : f32
    %44 = vector.broadcast %cst_50 : f32 to vector<2x8x128xf32>
    %c0_51 = arith.constant 0 : index
    %c0_52 = arith.constant 0 : index
    %c0_53 = arith.constant 0 : index
    %45 = vector.load %arg16[%c0_51, %c0_52, %c0_53] : memref<2x24x128xf32, #tpu.memory_space<vmem>>, vector<2x8x128xf32>
    tpu.vector_store %arg16[%c0_51, %c0_52, %c0_53], %44 {strides = array<i32>} : memref<2x24x128xf32, #tpu.memory_space<vmem>>, vector<2x8x128xf32>,
    %46 = vector.shape_cast %41 : vector<32x128xf32> to vector<2x16x128xf32>
    %c0_54 = arith.constant 0 : index
    %c8_55 = arith.constant 8 : index
    %c0_56 = arith.constant 0 : index
    %47 = vector.load %arg15[%c0_54, %c8_55, %c0_56] : memref<2x24x128xf32, #tpu.memory_space<vmem>>, vector<2x16x128xf32>
    tpu.vector_store %arg15[%c0_54, %c8_55, %c0_56], %46 {strides = array<i32>} : memref<2x24x128xf32, #tpu.memory_space<vmem>>, vector<2x16x128xf32>,
    %c0_57 = arith.constant 0 : index
    %c6 = arith.constant 6 : index
    %c0_58 = arith.constant 0 : index
    %48 = vector.load %arg15[%c0_57, %c6, %c0_58] : memref<2x24x128xf32, #tpu.memory_space<vmem>>, vector<2x16x128xf32>
    %49 = vector.shape_cast %48 : vector<2x16x128xf32> to vector<32x128xf32>
    %50 = tpu.concatenate %49, %41 in 1 : vector<32x128xf32>, vector<32x128xf32> -> vector<32x256xf32>
    %c0_59 = arith.constant 0 : index
    %c0_60 = arith.constant 0 : index
    %51 = vector.load %arg8[%c0_59, %c0_60] : memref<256x128xf32, #tpu.memory_space<vmem>>, vector<256x128xf32>
    %cst_61 = arith.constant dense<0.000000e+00> : vector<32x128xf32>
    %52 = tpu.matmul %50, %51, %cst_61 {dimension_numbers = #tpu.dot_dimension_numbers<[1], [0], [0], [1], [0, 0, 1, 1], [], []>} : vector<32x256xf32>, vector<256x128xf32>, vector<32x128xf32> -> vector<32x128xf32>
    %c0_62 = arith.constant 0 : index
    %c0_63 = arith.constant 0 : index
    %53 = vector.load %arg9[%c0_62, %c0_63] : memref<1x128xf32, #tpu.memory_space<vmem>>, vector<1x128xf32>
    %54 = vector.broadcast %53 : vector<1x128xf32> to vector<32x128xf32>
    %55 = arith.addf %52, %54 : vector<32x128xf32>
    %cst_64 = arith.constant 0.000000e+00 : f32
    %56 = vector.broadcast %cst_64 : f32 to vector<32x128xf32>
    %57 = arith.maximumf %55, %56 : vector<32x128xf32>
    %58 = vector.shape_cast %57 : vector<32x128xf32> to vector<2x16x128xf32>
    %c0_65 = arith.constant 0 : index
    %c8_66 = arith.constant 8 : index
    %c0_67 = arith.constant 0 : index
    %59 = vector.load %arg16[%c0_65, %c8_66, %c0_67] : memref<2x24x128xf32, #tpu.memory_space<vmem>>, vector<2x16x128xf32>
    tpu.vector_store %arg16[%c0_65, %c8_66, %c0_67], %58 {strides = array<i32>} : memref<2x24x128xf32, #tpu.memory_space<vmem>>, vector<2x16x128xf32>,
    %c0_68 = arith.constant 0 : index
    %c6_69 = arith.constant 6 : index
    %c0_70 = arith.constant 0 : index
    %60 = vector.load %arg16[%c0_68, %c6_69, %c0_70] : memref<2x24x128xf32, #tpu.memory_space<vmem>>, vector<2x16x128xf32>
    %61 = vector.shape_cast %60 : vector<2x16x128xf32> to vector<32x128xf32>
    %62 = tpu.concatenate %61, %57 in 1 : vector<32x128xf32>, vector<32x128xf32> -> vector<32x256xf32>
    %c0_71 = arith.constant 0 : index
    %c0_72 = arith.constant 0 : index
    %63 = vector.load %arg10[%c0_71, %c0_72] : memref<256x128xf32, #tpu.memory_space<vmem>>, vector<256x128xf32>
    %cst_73 = arith.constant dense<0.000000e+00> : vector<32x128xf32>
    %64 = tpu.matmul %62, %63, %cst_73 {dimension_numbers = #tpu.dot_dimension_numbers<[1], [0], [0], [1], [0, 0, 1, 1], [], []>} : vector<32x256xf32>, vector<256x128xf32>, vector<32x128xf32> -> vector<32x128xf32>
    %c0_74 = arith.constant 0 : index
    %c0_75 = arith.constant 0 : index
    %65 = vector.load %arg11[%c0_74, %c0_75] : memref<1x128xf32, #tpu.memory_space<vmem>>, vector<1x128xf32>
    %66 = vector.broadcast %65 : vector<1x128xf32> to vector<32x128xf32>
    %67 = arith.addf %64, %66 : vector<32x128xf32>
    %cst_76 = arith.constant 0.000000e+00 : f32
    %68 = vector.broadcast %cst_76 : f32 to vector<32x128xf32>
    %69 = arith.maximumf %67, %68 : vector<32x128xf32>
    %c0_77 = arith.constant 0 : index
    %c8_78 = arith.constant 8 : index
    %c0_79 = arith.constant 0 : index
    %70 = vector.load %arg15[%c0_77, %c8_78, %c0_79] : memref<2x24x128xf32, #tpu.memory_space<vmem>>, vector<2x16x128xf32>
    %71 = vector.shape_cast %70 : vector<2x16x128xf32> to vector<32x128xf32>
    %c0_80 = arith.constant 0 : index
    %c0_81 = arith.constant 0 : index
    %72 = vector.load %arg12[%c0_80, %c0_81] : memref<128x128xf32, #tpu.memory_space<vmem>>, vector<128x128xf32>
    %cst_82 = arith.constant dense<0.000000e+00> : vector<32x128xf32>
    %73 = tpu.matmul %71, %72, %cst_82 {dimension_numbers = #tpu.dot_dimension_numbers<[1], [0], [0], [1], [0, 0, 1, 1], [], []>} : vector<32x128xf32>, vector<128x128xf32>, vector<32x128xf32> -> vector<32x128xf32>
    %c0_83 = arith.constant 0 : index
    %c0_84 = arith.constant 0 : index
    %74 = vector.load %arg13[%c0_83, %c0_84] : memref<1x128xf32, #tpu.memory_space<vmem>>, vector<1x128xf32>
    %75 = vector.broadcast %74 : vector<1x128xf32> to vector<32x128xf32>
    %76 = arith.addf %73, %75 : vector<32x128xf32>
    %77 = arith.addf %69, %76 : vector<32x128xf32>
    %cst_85 = arith.constant 0.000000e+00 : f32
    %78 = vector.broadcast %cst_85 : f32 to vector<32x128xf32>
    %79 = arith.maximumf %77, %78 : vector<32x128xf32>
    %80 = vector.shape_cast %79 : vector<32x128xf32> to vector<2x16x128xf32>
    %c0_86 = arith.constant 0 : index
    %c0_87 = arith.constant 0 : index
    %c0_88 = arith.constant 0 : index
    %81 = vector.load %arg14[%c0_86, %c0_87, %c0_88] : memref<2x16x128xf32, #tpu.memory_space<vmem>>, vector<2x16x128xf32>
    tpu.vector_store %arg14[%c0_86, %c0_87, %c0_88], %80 {strides = array<i32>} : memref<2x16x128xf32, #tpu.memory_space<vmem>>, vector<2x16x128xf32>,
    return
  }
  func.func @transform_0(%arg0: i32) -> (i32, i32, i32) {
    %c0_i32 = arith.constant 0 : i32
    %c0_i32_0 = arith.constant 0 : i32
    %c0_i32_1 = arith.constant 0 : i32
    return %arg0, %c0_i32, %c0_i32_0 : i32, i32, i32
  }
  func.func @transform_1(%arg0: i32) -> (i32, i32) {
    %c0_i32 = arith.constant 0 : i32
    %c0_i32_0 = arith.constant 0 : i32
    %c0_i32_1 = arith.constant 0 : i32
    return %c0_i32, %c0_i32_0 : i32, i32
  }
  func.func @transform_2(%arg0: i32) -> (i32, i32) {
    %c0_i32 = arith.constant 0 : i32
    %c0_i32_0 = arith.constant 0 : i32
    %c0_i32_1 = arith.constant 0 : i32
    return %c0_i32, %c0_i32_0 : i32, i32
  }
  func.func @transform_3(%arg0: i32) -> (i32, i32) {
    %c0_i32 = arith.constant 0 : i32
    %c0_i32_0 = arith.constant 0 : i32
    %c0_i32_1 = arith.constant 0 : i32
    return %c0_i32, %c0_i32_0 : i32, i32
  }
  func.func @transform_4(%arg0: i32) -> (i32, i32) {
    %c0_i32 = arith.constant 0 : i32
    %c0_i32_0 = arith.constant 0 : i32
    %c0_i32_1 = arith.constant 0 : i32
    return %c0_i32, %c0_i32_0 : i32, i32
  }
  func.func @transform_5(%arg0: i32) -> (i32, i32) {
    %c0_i32 = arith.constant 0 : i32
    %c0_i32_0 = arith.constant 0 : i32
    %c0_i32_1 = arith.constant 0 : i32
    return %c0_i32, %c0_i32_0 : i32, i32
  }
  func.func @transform_6(%arg0: i32) -> (i32, i32) {
    %c0_i32 = arith.constant 0 : i32
    %c0_i32_0 = arith.constant 0 : i32
    %c0_i32_1 = arith.constant 0 : i32
    return %c0_i32, %c0_i32_0 : i32, i32
  }
  func.func @transform_7(%arg0: i32) -> (i32, i32) {
    %c0_i32 = arith.constant 0 : i32
    %c0_i32_0 = arith.constant 0 : i32
    %c0_i32_1 = arith.constant 0 : i32
    return %c0_i32, %c0_i32_0 : i32, i32
  }
  func.func @transform_8(%arg0: i32) -> (i32, i32) {
    %c0_i32 = arith.constant 0 : i32
    %c0_i32_0 = arith.constant 0 : i32
    %c0_i32_1 = arith.constant 0 : i32
    return %c0_i32, %c0_i32_0 : i32, i32
  }
  func.func @transform_9(%arg0: i32) -> (i32, i32) {
    %c0_i32 = arith.constant 0 : i32
    %c0_i32_0 = arith.constant 0 : i32
    %c0_i32_1 = arith.constant 0 : i32
    return %c0_i32, %c0_i32_0 : i32, i32
  }
  func.func @transform_10(%arg0: i32) -> (i32, i32) {
    %c0_i32 = arith.constant 0 : i32
    %c0_i32_0 = arith.constant 0 : i32
    %c0_i32_1 = arith.constant 0 : i32
    return %c0_i32, %c0_i32_0 : i32, i32
  }
  func.func @transform_11(%arg0: i32) -> (i32, i32) {
    %c0_i32 = arith.constant 0 : i32
    %c0_i32_0 = arith.constant 0 : i32
    %c0_i32_1 = arith.constant 0 : i32
    return %c0_i32, %c0_i32_0 : i32, i32
  }
  func.func @transform_12(%arg0: i32) -> (i32, i32) {
    %c0_i32 = arith.constant 0 : i32
    %c0_i32_0 = arith.constant 0 : i32
    %c0_i32_1 = arith.constant 0 : i32
    return %c0_i32, %c0_i32_0 : i32, i32
  }
  func.func @transform_13(%arg0: i32) -> (i32, i32, i32) {
    %c0_i32 = arith.constant 0 : i32
    %c0_i32_0 = arith.constant 0 : i32
    %c0_i32_1 = arith.constant 0 : i32
    return %arg0, %c0_i32, %c0_i32_0 : i32, i32, i32
  }
}

</mosaic_0001>

<bundles_post_ra>
// kernel: tpu_custom_call.1
= control target key start
LH: loop header
LB: loop body
LE: loop exit
PB: predicated region body
PF: predicated region fallthrough
CT: control target
= control target key end

     0   :  { %18 = vsyncpa [#allocation5], 0  ;;  %s1234_s0 = inlined_call_operand.vmem [shape: f32[2,16,4], index: 0, kind: input, shape index: {}]   ;;  %s1235_s1 = inlined_call_operand.hbm [shape: f32[256,128], index: 1, kind: input, shape index: {}]   ;;  %s1236_s2 = inlined_call_operand.vmem [shape: f32[1,128], index: 2, kind: input, shape index: {}]   ;;  %s1237_s3 = inlined_call_operand.hbm [shape: f32[256,128], index: 3, kind: input, shape index: {}]   ;;  %s1238_s4 = inlined_call_operand.vmem [shape: f32[1,128], index: 4, kind: input, shape index: {}]   ;;  %s1239_s5 = inlined_call_operand.hbm [shape: f32[128,128], index: 5, kind: input, shape index: {}]   ;;  %s1240_s6 = inlined_call_operand.vmem [shape: f32[1,128], index: 6, kind: input, shape index: {}]   ;;  %s1241_s7 = inlined_call_operand.hbm [shape: f32[256,128], index: 7, kind: input, shape index: {}]   ;;  %s1242_s8 = inlined_call_operand.vmem [shape: f32[1,128], index: 8, kind: input, shape index: {}]   ;;  %s1243_s9 = inlined_call_operand.hbm [shape: f32[256,128], index: 9, kind: input, shape index: {}]   ;;  %s1244_s10 = inlined_call_operand.vmem [shape: f32[1,128], index: 10, kind: input, shape index: {}]   ;;  %s1245_s11 = inlined_call_operand.hbm [shape: f32[128,128], index: 11, kind: input, shape index: {}]   ;;  %s1246_s12 = inlined_call_operand.vmem [shape: f32[1,128], index: 12, kind: input, shape index: {}]   ;;  %s1247_s13 = inlined_call_operand.hbm [shape: f32[2,16,128], index: 13, kind: output, shape index: {}]  }
   0x1   :  { %19 = vsyncpa [#allocation8], 0 }
   0x2   :  { %20 = vsyncpa [#allocation11], 0 }
   0x3   :  { %21 = vsyncpa [#allocation14], 0 }
   0x4   :  { %22 = vsyncpa [#allocation6], 0  ;;  %s44_s27 = sshll.u32 %s1237_s3, 4  ;;  %s959_s28 = smov [#allocation7]   ;;  %s45_s27 = int_to_ptr.hbm [resolvable:$true] %s44_s27 }
   0x5   :  { %s46_s29 = sshll.u32 %s959_s28, 4  ;;  %s74_s15 = sshll.u32 %s1241_s7, 4  ;;  %s47_s29 = int_to_ptr.vmem [resolvable:$true] %s46_s29  ;;  %s75_s15 = int_to_ptr.hbm [resolvable:$true] %s74_s15 }
   0x6   :  { %s960_s16 = smov 128   ;;  %s961_s17 = smov 8  }
   0x7   :  { %52 = dma.hbm_to_vmem [thread:$0]  %s45_s27, 4096, %s47_s29, [#allocation8], %s960_s16, %s960_s16, %s961_s17  }
   0x8   :  { %s962_s18 = smov [#allocation10]   ;;  %s29_s3 = sshll.u32 %s1235_s1, 4  ;;  %s30_s3 = int_to_ptr.hbm [resolvable:$true] %s29_s3 }
   0x9   :  { %s76_s19 = sshll.u32 %s962_s18, 4  ;;  %s59_s23 = sshll.u32 %s1239_s5, 4  ;;  %s77_s19 = int_to_ptr.vmem [resolvable:$true] %s76_s19  ;;  %s60_s23 = int_to_ptr.hbm [resolvable:$true] %s59_s23 }
   0xa   :  { %82 = dma.hbm_to_vmem [thread:$0]  %s75_s15, 4096, %s77_s19, [#allocation11], %s960_s16, %s960_s16, %s961_s17  }
   0xb   :  { %s963_s24 = smov [#allocation4]   ;;  %s964_s26 = smov [#allocation9]  }
   0xc   :  { %s31_s25 = sshll.u32 %s963_s24, 4  ;;  %s61_s1 = sshll.u32 %s964_s26, 4  ;;  %s32_s25 = int_to_ptr.vmem [resolvable:$true] %s31_s25  ;;  %s62_s1 = int_to_ptr.vmem [resolvable:$true] %s61_s1 }
   0xd   :  { %37 = dma.hbm_to_vmem [thread:$0]  %s30_s3, 4096, %s32_s25, [#allocation5], %s960_s16, %s960_s16, %s961_s17  }
   0xe   :  { %s89_s29 = sshll.u32 %s1243_s9, 4  ;;  %s104_s14 = sshll.u32 %s1245_s11, 4  ;;  %s90_s29 = int_to_ptr.hbm [resolvable:$true] %s89_s29  ;;  %s105_s14 = int_to_ptr.hbm [resolvable:$true] %s104_s14 }
   0xf   :  { %67 = dma.hbm_to_vmem [thread:$0]  %s60_s23, 2048, %s62_s1, [#allocation8], %s960_s16, %s960_s16, %s961_s17  }
  0x10   :  { %s965_s15 = smov [#allocation12]   ;;  %s966_s19 = smov [#allocation13]  }
  0x11   :  { %s91_s18 = sshll.u32 %s965_s15, 4  ;;  %s106_s9 = sshll.u32 %s966_s19, 4  ;;  %s92_s18 = int_to_ptr.vmem [resolvable:$true] %s91_s18  ;;  %s107_s9 = int_to_ptr.vmem [resolvable:$true] %s106_s9 }
  0x12   :  { %97 = dma.hbm_to_vmem [thread:$0]  %s90_s29, 4096, %s92_s18, [#allocation11], %s960_s16, %s960_s16, %s961_s17  }
  0x13   :  { %112 = dma.hbm_to_vmem [thread:$0]  %s105_s14, 2048, %s107_s9, [#allocation14], %s960_s16, %s960_s16, %s961_s17  }
  0x14   :  { %949 = dma.done.wait [#allocation5], 4096  }
  0x15   :  { %950 = vsyncadd [#allocation5], 4294963200 }
  0x16   :  { %951 = dma.done.wait [#allocation8], 6144  }
  0x17   :  { %952 = vsyncadd [#allocation8], 4294961152 }
  0x18   :  { %953 = dma.done.wait [#allocation11], 8192  }
  0x19   :  { %954 = vsyncadd [#allocation11], 4294959104 }
  0x1a   :  { %955 = dma.done.wait [#allocation14], 2048  }
  0x1b   :  { %956 = vsyncadd [#allocation14], 4294965248  ;;  %v967_v0 = vmov 0.0   ;;  %v180_v1 = vld [vmem:[#allocation4 + $0x78] sm:$0xff]  ;;  %v179_v2 = vld [vmem:[#allocation4 + $0x70] sm:$0xff]  ;;  %vm147_vm0 = vcmask 31744  }
  0x1c   :  { %139 = vst [vmem:[#allocation2] sm:$0xff] %v967_v0  ;;  %v196_v3 = vld [vmem:[#allocation4 + $0xf8] sm:$0xff]  ;;  %201 = vmatpush.msra.mxu0 %v180_v1  ;;  %v195_v4 = vld [vmem:[#allocation4 + $0xf0] sm:$0xff]  ;;  %v178_v5 = vld [vmem:[#allocation4 + $0x68] sm:$0xff]  ;;  %vm152_vm1 = vcmask 1047584   ;;  %s717_s15 = sshll.u32 %s1247_s13, 4  ;;  %s718_s15 = int_to_ptr.hbm [resolvable:$true] %s717_s15 }
  0x1d   :  { %140 = vst [vmem:[#allocation2 + $0x18] sm:$0xff] %v967_v0  ;;  %230 = vmatpush.msra.mxu1 %v196_v3  ;;  %v194_v6 = vld [vmem:[#allocation4 + $0xe8] sm:$0xff]  ;;  %v177_v7 = vld [vmem:[#allocation4 + $0x60] sm:$0xff]  ;;  %v176_v9 = vld [vmem:[#allocation4 + $0x58] sm:$0xff] }
  0x1e   :  { %141 = vst [vmem:[#allocation3] sm:$0xff] %v967_v0  ;;  %202 = vmatpush.msra.mxu0 %v179_v2  ;;  %v193_v8 = vld [vmem:[#allocation4 + $0xe0] sm:$0xff]  ;;  %v192_v10 = vld [vmem:[#allocation4 + $0xd8] sm:$0xff]  ;;  %v175_v11 = vld [vmem:[#allocation4 + $0x50] sm:$0xff] }
  0x1f   :  { %142 = vst [vmem:[#allocation3 + $0x18] sm:$0xff] %v967_v0  ;;  %231 = vmatpush.msra.mxu1 %v195_v4  ;;  %v191_v12 = vld [vmem:[#allocation4 + $0xd0] sm:$0xff]  ;;  %v174_v13 = vld [vmem:[#allocation4 + $0x48] sm:$0xff]  ;;  %v173_v14 = vld [vmem:[#allocation4 + $0x40] sm:$0xff] }
  0x20   :  { %203 = vmatpush.msra.mxu0 %v178_v5  ;;  %v190_v15 = vld [vmem:[#allocation4 + $0xc8] sm:$0xff]  ;;  %v143_v16 = vld [vmem:[%s1234_s0] sm:$0xff]  ;;  %v145_v19 = vld [vmem:[%s1234_s0 + $0x10] sm:$0xff] }
  0x21   :  { %232 = vmatpush.msra.mxu1 %v194_v6  ;;  %v189_v17 = vld [vmem:[#allocation4 + $0xc0] sm:$0xff]  ;;  %148 = vst.msk [vmem:[#allocation2 + $0x8] sm:$0xff] %vm147_vm0, %v143_v16  ;;  %v144_v18 = vld [vmem:[%s1234_s0 + $0x8] sm:$0xff]  ;;  %v172_v20 = vld [vmem:[#allocation4 + $0x38] sm:$0xff] }
  0x22   :  { %204 = vmatpush.msra.mxu0 %v177_v7  ;;  %153 = vst.msk [vmem:[#allocation2 + $0x8] sm:$0xff] %vm152_vm1, %v967_v0  ;;  %v188_v21 = vld [vmem:[#allocation4 + $0xb8] sm:$0xff]  ;;  %v171_v23 = vld [vmem:[#allocation4 + $0x30] sm:$0xff]  ;;  %v170_v25 = vld [vmem:[#allocation4 + $0x28] sm:$0xff] }
  0x23   :  { %233 = vmatpush.msra.mxu1 %v193_v8  ;;  %149 = vst.msk [vmem:[#allocation2 + $0x10] sm:$0xff] %vm147_vm0, %v144_v18  ;;  %v146_v22 = vld [vmem:[%s1234_s0 + $0x18] sm:$0xff]  ;;  %v187_v24 = vld [vmem:[#allocation4 + $0xb0] sm:$0xff]  ;;  %v186_v26 = vld [vmem:[#allocation4 + $0xa8] sm:$0xff] }
  0x24   :  { %205 = vmatpush.msra.mxu0 %v176_v9  ;;  %154 = vst.msk [vmem:[#allocation2 + $0x10] sm:$0xff] %vm152_vm1, %v967_v0  ;;  %v169_v28 = vld [vmem:[#allocation4 + $0x20] sm:$0xff]  ;;  %v168_v30 = vld [vmem:[#allocation4 + $0x18] sm:$0xff]  ;;  %v167_v33 = vld [vmem:[#allocation4 + $0x10] sm:$0xff] }
  0x25   :  { %234 = vmatpush.msra.mxu1 %v192_v10  ;;  %150 = vst.msk [vmem:[#allocation2 + $0x20] sm:$0xff] %vm147_vm0, %v145_v19  ;;  %v185_v29 = vld [vmem:[#allocation4 + $0xa0] sm:$0xff]  ;;  %v184_v31 = vld [vmem:[#allocation4 + $0x98] sm:$0xff]  ;;  %v183_v34 = vld [vmem:[#allocation4 + $0x90] sm:$0xff] }
  0x26   :  { %206 = vmatpush.msra.mxu0 %v175_v11  ;;  %155 = vst.msk [vmem:[#allocation2 + $0x20] sm:$0xff] %vm152_vm1, %v967_v0  ;;  %v302_v35 = vld [vmem:[#allocation7 + $0xf8] sm:$0xff]  ;;  %v301_v36 = vld [vmem:[#allocation7 + $0xf0] sm:$0xff]  ;;  %v166_v37 = vld [vmem:[#allocation4 + $0x8] sm:$0xff] }
  0x27   :  { %235 = vmatpush.msra.mxu1 %v191_v12  ;;  %151 = vst.msk [vmem:[#allocation2 + $0x28] sm:$0xff] %vm147_vm0, %v146_v22  ;;  %v182_v38 = vld [vmem:[#allocation4 + $0x88] sm:$0xff]  ;;  %336 = vmatpush.msra.mxu3 %v302_v35  ;;  %v286_v39 = vld [vmem:[#allocation7 + $0x78] sm:$0xff]  ;;  %v285_v41 = vld [vmem:[#allocation7 + $0x70] sm:$0xff] }
  0x28   :  { %207 = vmatpush.msra.mxu0 %v174_v13  ;;  %156 = vst.msk [vmem:[#allocation2 + $0x28] sm:$0xff] %vm152_vm1, %v967_v0  ;;  %v300_v40 = vld [vmem:[#allocation7 + $0xe8] sm:$0xff]  ;;  %v165_v42 = vld [vmem:[#allocation4] sm:$0xff]  ;;  %307 = vmatpush.msra.mxu2 %v286_v39  ;;  %v388_v47 = vld [vmem:[#allocation9 + $0x78] sm:$0xff] }
  0x29   :  { %236 = vmatpush.msra.mxu1 %v190_v15  ;;  %v157_v27 = vld [vmem:[#allocation2 + $0x7] sm:$0xff]  ;;  %337 = vmatpush.msra.mxu3 %v301_v36  ;;  %v298_v48 = vld [vmem:[#allocation7 + $0xd8] sm:$0xff]  ;;  %v387_v50 = vld [vmem:[#allocation9 + $0x70] sm:$0xff] }
  0x2a   :  { %208 = vmatpush.msra.mxu0 %v173_v14  ;;  %430 = vst [vmem:[#allocation2] sm:$0xff] %v967_v0  ;;  %v181_v43 = vld [vmem:[#allocation4 + $0x80] sm:$0xff]  ;;  %v1107_v44 = vld [vmem:[#allocation2 + $0x8] sm:$0xff]  ;;  %308 = vmatpush.msra.mxu2 %v285_v41  ;;  %v297_v51 = vld [vmem:[#allocation7 + $0xd0] sm:$0xff] }
  0x2b   :  { %237 = vmatpush.msra.mxu1 %v189_v17  ;;  %338 = vmatpush.msra.mxu3 %v300_v40  ;;  %v299_v45 = vld [vmem:[#allocation7 + $0xe0] sm:$0xff]  ;;  %v284_v46 = vld [vmem:[#allocation7 + $0x68] sm:$0xff]  ;;  %v282_v52 = vld [vmem:[#allocation7 + $0x58] sm:$0xff] }
  0x2c   :  { %209 = vmatpush.msra.mxu0 %v172_v20  ;;  %v283_v49 = vld [vmem:[#allocation7 + $0x60] sm:$0xff]  ;;  %309 = vmatpush.msra.mxu2 %v284_v46  ;;  %v386_v53 = vld [vmem:[#allocation9 + $0x68] sm:$0xff]  ;;  %v281_v55 = vld [vmem:[#allocation7 + $0x50] sm:$0xff] }
  0x2d   :  { %238 = vmatpush.msra.mxu1 %v188_v21  ;;  %v1104_v32 = vld [vmem:[#allocation2 + $0x1f] sm:$0xff]  ;;  %339 = vmatpush.msra.mxu3 %v299_v45  ;;  %v296_v54 = vld [vmem:[#allocation7 + $0xc8] sm:$0xff]  ;;  %v1110_v57 = vld [vmem:[#allocation2 + $0x10] sm:$0xff] }
  0x2e   :  { %210 = vmatpush.msra.mxu0 %v171_v23  ;;  %431 = vst [vmem:[#allocation2 + $0x18] sm:$0xff] %v967_v0  ;;  %310 = vmatpush.msra.mxu2 %v283_v49  ;;  %v158_v56 = vld [vmem:[#allocation2 + $0xf] sm:$0xff]  ;;  %v295_v58 = vld [vmem:[#allocation7 + $0xc0] sm:$0xff]  ;;  %v294_v61 = vld [vmem:[#allocation7 + $0xb8] sm:$0xff] }
  0x2f   :  { %239 = vmatpush.msra.mxu1 %v187_v24  ;;  %340 = vmatpush.msra.mxu3 %v298_v48  ;;  %v280_v59 = vld [vmem:[#allocation7 + $0x48] sm:$0xff]  ;;  %v385_v60 = vld [vmem:[#allocation9 + $0x60] sm:$0xff]  ;;  %v293_v63 = vld [vmem:[#allocation7 + $0xb0] sm:$0xff] }
  0x30   :  { %211 = vmatpush.msra.mxu0 %v170_v25  ;;  %311 = vmatpush.msra.mxu2 %v282_v52  ;;  %v279_v62 = vld [vmem:[#allocation7 + $0x40] sm:$0xff]  ;;  %v292_v1 = vld [vmem:[#allocation7 + $0xa8] sm:$0xff]  ;;  %v278_v6 = vld [vmem:[#allocation7 + $0x38] sm:$0xff] }
  0x31   :  { %240 = vmatpush.msra.mxu1 %v186_v26  ;;  %341 = vmatpush.msra.mxu3 %v297_v51  ;;  %v1113_v2 = vld [vmem:[#allocation2 + $0x20] sm:$0xff]  ;;  %v1117_v5 = vld [vmem:[#allocation2 + $0x28] sm:$0xff]  ;;  %v290_v7 = vld [vmem:[#allocation7 + $0x98] sm:$0xff] }
  0x32   :  { %212 = vmatpush.msra.mxu0 %v169_v28  ;;  %312 = vmatpush.msra.mxu2 %v281_v55  ;;  %v291_v3 = vld [vmem:[#allocation7 + $0xa0] sm:$0xff]  ;;  %v384_v8 = vld [vmem:[#allocation9 + $0x58] sm:$0xff]  ;;  %v277_v9 = vld [vmem:[#allocation7 + $0x30] sm:$0xff] }
  0x33   :  { %241 = vmatpush.msra.mxu1 %v185_v29  ;;  %342 = vmatpush.msra.mxu3 %v296_v54  ;;  %v160_v4 = vld [vmem:[#allocation2 + $0x27] sm:$0xff]  ;;  %v289_v10 = vld [vmem:[#allocation7 + $0x90] sm:$0xff]  ;;  %v274_v18 = vld [vmem:[#allocation7 + $0x18] sm:$0xff] }
  0x34   :  { %213 = vmatpush.msra.mxu0 %v168_v30  ;;  %313 = vmatpush.msra.mxu2 %v280_v59  ;;  %v383_v11 = vld [vmem:[#allocation9 + $0x50] sm:$0xff]  ;;  %v276_v12 = vld [vmem:[#allocation7 + $0x28] sm:$0xff]  ;;  %v275_v15 = vld [vmem:[#allocation7 + $0x20] sm:$0xff] }
  0x35   :  { %242 = vmatpush.msra.mxu1 %v184_v31  ;;  %343 = vmatpush.msra.mxu3 %v295_v58  ;;  %v288_v13 = vld [vmem:[#allocation7 + $0x88] sm:$0xff]  ;;  %v287_v16 = vld [vmem:[#allocation7 + $0x80] sm:$0xff]  ;;  %v380_v19 = vld [vmem:[#allocation9 + $0x38] sm:$0xff] }
  0x36   :  { %214 = vmatpush.msra.mxu0 %v167_v33  ;;  %314 = vmatpush.msra.mxu2 %v279_v62  ;;  %v382_v14 = vld [vmem:[#allocation9 + $0x48] sm:$0xff]  ;;  %v381_v17 = vld [vmem:[#allocation9 + $0x40] sm:$0xff]  ;;  %v273_v20 = vld [vmem:[#allocation7 + $0x10] sm:$0xff] }
  0x37   :  { %243 = vmatpush.msra.mxu1 %v183_v34  ;;  %344 = vmatpush.msra.mxu3 %v294_v61  ;;  %v379_v21 = vld [vmem:[#allocation9 + $0x30] sm:$0xff]  ;;  %v272_v22 = vld [vmem:[#allocation7 + $0x8] sm:$0xff]  ;;  %v271_v24 = vld [vmem:[#allocation7] sm:$0xff] }
  0x38   :  { %215 = vmatpush.msra.mxu0 %v166_v37  ;;  %315 = vmatpush.msra.mxu2 %v278_v6  ;;  %v378_v23 = vld [vmem:[#allocation9 + $0x28] sm:$0xff]  ;;  %v377_v25 = vld [vmem:[#allocation9 + $0x20] sm:$0xff]  ;;  %v376_v26 = vld [vmem:[#allocation9 + $0x18] sm:$0xff] }
  0x39   :  { %244 = vmatpush.msra.mxu1 %v182_v38  ;;  %345 = vmatpush.msra.mxu3 %v293_v63  ;;  %v374_v28 = vld [vmem:[#allocation9 + $0x8] sm:$0xff]  ;;  %v373_v29 = vld [vmem:[#allocation9] sm:$0xff]  ;;  %v473_v36 = vld [vmem:[#allocation10 + $0xf8] sm:$0xff] }
  0x3a   :  { %216 = vmatpush.msra.mxu0 %v165_v42  ;;  %316 = vmatpush.msra.mxu2 %v277_v9  ;;  %v775_v30 = vld [vmem:[%s1236_s2] ss:$0 sm:$0xff]  ;;  %v472_v37 = vld [vmem:[#allocation10 + $0xf0] sm:$0xff]  ;;  %v457_v40 = vld [vmem:[#allocation10 + $0x78] sm:$0xff] }
  0x3b   :  { %245 = vmatpush.msra.mxu1 %v181_v43  ;;  %217 = vmatmul.f32.vlgmr.msra.gmra.mxu0 %v157_v27  ;;  %v375_v27 = vld [vmem:[#allocation9 + $0x10] sm:$0xff]  ;;  %v471_v42 = vld [vmem:[#allocation10 + $0xe8] sm:$0xff]  ;;  %v470_v46 = vld [vmem:[#allocation10 + $0xe0] sm:$0xff] }
  0x3c   :  { %246 = vmatmul.f32.vlgmr.msra.gmra.mxu1 %v1107_v44  ;;  %393 = vmatpush.msrb.mxu0 %v388_v47  ;;  %v456_v43 = vld [vmem:[#allocation10 + $0x70] sm:$0xff]  ;;  %v469_v48 = vld [vmem:[#allocation10 + $0xd8] sm:$0xff]  ;;  %v463_v9 = vld [vmem:[#allocation10 + $0xa8] sm:$0xff] }
  0x3d   :  { %346 = vmatpush.msra.mxu3 %v292_v1  ;;  %317 = vmatpush.msra.mxu2 %v276_v12  ;;  %v467_v1 = vld [vmem:[#allocation10 + $0xc8] sm:$0xff]  ;;  %v452_v6 = vld [vmem:[#allocation10 + $0x50] sm:$0xff]  ;;  %v461_v12 = vld [vmem:[#allocation10 + $0x98] sm:$0xff] }
  0x3e   :  { %394 = vmatpush.msrb.mxu0 %v387_v50  ;;  %478 = vmatpush.msrb.mxu1 %v457_v40  ;;  %v468_v50 = vld [vmem:[#allocation10 + $0xd0] sm:$0xff] }
  0x3f   :  { %347 = vmatpush.msra.mxu3 %v291_v3  ;;  %318 = vmatpush.msra.mxu2 %v275_v15  ;;  %v466_v3 = vld [vmem:[#allocation10 + $0xc0] sm:$0xff]  ;;  %v447_v15 = vld [vmem:[#allocation10 + $0x28] sm:$0xff]  ;;  %v1161_v40 = vld [vmem:[#allocation13 + $0x30] sm:$0xff] }
  0x40   :  { %395 = vmatpush.msrb.mxu0 %v386_v53  ;;  %479 = vmatpush.msrb.mxu1 %v456_v43  ;;  %v1164_v43 = vld [vmem:[#allocation13 + $0x28] sm:$0xff] }
  0x41   :  { %348 = vmatpush.msra.mxu3 %v290_v7  ;;  %319 = vmatpush.msra.mxu2 %v274_v18  ;;  %v464_v7 = vld [vmem:[#allocation10 + $0xb0] sm:$0xff]  ;;  %v458_v18 = vld [vmem:[#allocation10 + $0x80] sm:$0xff] }
  0x42   :  { %396 = vmatpush.msrb.mxu0 %v385_v60 }
  0x43   :  { %220 = vmatmul.f32.gmra.mxu0 %v158_v56  ;;  %349 = vmatpush.msra.mxu3 %v289_v10  ;;  %v462_v10 = vld [vmem:[#allocation10 + $0xa0] sm:$0xff] }
  0x44   :  { %249 = vmatmul.f32.gmra.mxu1 %v1110_v57  ;;  %397 = vmatpush.msrb.mxu0 %v384_v8  ;;  %v451_v8 = vld [vmem:[#allocation10 + $0x48] sm:$0xff] }
  0x45   :  { %350 = vmatpush.msra.mxu3 %v288_v13  ;;  %320 = vmatpush.msra.mxu2 %v273_v20  ;;  %v448_v13 = vld [vmem:[#allocation10 + $0x30] sm:$0xff] }
  0x46   :  { %398 = vmatpush.msrb.mxu0 %v383_v11  ;;  %v449_v11 = vld [vmem:[#allocation10 + $0x38] sm:$0xff]  ;;  %v444_v20 = vld [vmem:[#allocation10 + $0x10] sm:$0xff] }
  0x47   :  { %351 = vmatpush.msra.mxu3 %v287_v16  ;;  %321 = vmatpush.msra.mxu2 %v272_v22  ;;  %v459_v16 = vld [vmem:[#allocation10 + $0x88] sm:$0xff]  ;;  %v442_v22 = vld [vmem:[#allocation10] sm:$0xff] }
  0x48   :  { %399 = vmatpush.msrb.mxu0 %v382_v14  ;;  %v460_v14 = vld [vmem:[#allocation10 + $0x90] sm:$0xff] }
  0x49   :  { %322 = vmatpush.msra.mxu2 %v271_v24  ;;  %v1132_v24 = vld [vmem:[#allocation13 + $0x70] sm:$0xff] }
  0x4a   :  { %400 = vmatpush.msrb.mxu0 %v381_v17  ;;  %v446_v17 = vld [vmem:[#allocation10 + $0x20] sm:$0xff] }
  0x4b   :  { %223 = vmatmul.f32.gmra.mxu0 %v1104_v32  ;;  %507 = vmatpush.msrb.mxu2 %v473_v36 }
  0x4c   :  { %252 = vmatmul.f32.gmra.mxu1 %v1113_v2  ;;  %401 = vmatpush.msrb.mxu0 %v380_v19  ;;  %v445_v19 = vld [vmem:[#allocation10 + $0x18] sm:$0xff] }
  0x4d   :  { %508 = vmatpush.msrb.mxu2 %v472_v37 }
  0x4e   :  { %402 = vmatpush.msrb.mxu0 %v379_v21  ;;  %v443_v21 = vld [vmem:[#allocation10 + $0x8] sm:$0xff] }
  0x4f   :  { %509 = vmatpush.msrb.mxu2 %v471_v42 }
  0x50   :  { %403 = vmatpush.msrb.mxu0 %v378_v23  ;;  %v1129_v23 = vld [vmem:[#allocation13 + $0x78] sm:$0xff] }
  0x51   :  { %510 = vmatpush.msrb.mxu2 %v470_v46  ;;  %v1167_v46 = vld [vmem:[#allocation13 + $0x20] sm:$0xff] }
  0x52   :  { %404 = vmatpush.msrb.mxu0 %v377_v25  ;;  %v1135_v25 = vld [vmem:[#allocation13 + $0x68] sm:$0xff] }
  0x53   :  { %226 = vmatmul.f32.gmra.mxu0 %v160_v4  ;;  %511 = vmatpush.msrb.mxu2 %v469_v48  ;;  %v453_v4 = vld [vmem:[#allocation10 + $0x58] sm:$0xff] }
  0x54   :  { %255 = vmatmul.f32.gmra.mxu1 %v1117_v5  ;;  %405 = vmatpush.msrb.mxu0 %v376_v26  ;;  %v1138_v26 = vld [vmem:[#allocation13 + $0x60] sm:$0xff] }
  0x55   :  { %512 = vmatpush.msrb.mxu2 %v468_v50 }
  0x56   :  { %406 = vmatpush.msrb.mxu0 %v375_v27 }
  0x57   :  { %513 = vmatpush.msrb.mxu2 %v467_v1 }
  0x58   :  { %407 = vmatpush.msrb.mxu0 %v374_v28  ;;  %v1141_v28 = vld [vmem:[#allocation13 + $0x58] sm:$0xff] }
  0x59   :  { %514 = vmatpush.msrb.mxu2 %v466_v3 }
  0x5a   :  { %408 = vmatpush.msrb.mxu0 %v373_v29 }
  0x5b   :  { %409 = vmatmul.f32.vlgmr.msrb.gmra.mxu0 %v1107_v44  ;;  %v455_v44 = vld [vmem:[#allocation10 + $0x68] sm:$0xff] }
  0x5c   :  { %480 = vmatpush.msrb.mxu1 %v455_v44 }
  0x63   :  { %412 = vmatmul.f32.gmra.mxu0 %v1110_v57 }
  0x6b   :  { %415 = vmatmul.f32.gmra.mxu0 %v1113_v2  ;;  %v454_v2 = vld [vmem:[#allocation10 + $0x60] sm:$0xff] }
  0x6c   :  { %481 = vmatpush.msrb.mxu1 %v454_v2 }
  0x6e   :  { %482 = vmatpush.msrb.mxu1 %v453_v4 }
  0x70   :  { %483 = vmatpush.msrb.mxu1 %v452_v6 }
  0x72   :  { %484 = vmatpush.msrb.mxu1 %v451_v8 }
  0x73   :  { %418 = vmatmul.f32.gmra.mxu0 %v1117_v5  ;;  %v465_v5 = vld [vmem:[#allocation10 + $0xb8] sm:$0xff] }
  0x74   :  { %515 = vmatpush.msrb.mxu2 %v465_v5 }
  0x76   :  { %516 = vmatpush.msrb.mxu2 %v464_v7 }
  0x78   :  { %517 = vmatpush.msrb.mxu2 %v463_v9 }
  0x7a   :  { %518 = vmatpush.msrb.mxu2 %v462_v10 }
  0x7c   :  { %519 = vmatpush.msrb.mxu2 %v461_v12  ;;  %v579_v12 = vld [vmem:[#allocation12 + $0xf8] sm:$0xff] }
  0x7d   :  { %613 = vmatpush.msra.mxu0 %v579_v12 }
  0x7e   :  { %520 = vmatpush.msrb.mxu2 %v460_v14  ;;  %v563_v14 = vld [vmem:[#allocation12 + $0x78] sm:$0xff] }
  0x7f   :  { %584 = vmatpush.msrb.mxu3 %v563_v14 }
  0x80   :  { %521 = vmatpush.msrb.mxu2 %v459_v16  ;;  %v577_v16 = vld [vmem:[#allocation12 + $0xe8] sm:$0xff] }
  0x82   :  { %522 = vmatpush.msrb.mxu2 %v458_v18  ;;  %v561_v18 = vld [vmem:[#allocation12 + $0x68] sm:$0xff] }
  0xb8   :  { %v218_v31 = vpop.f32.mrf.mxu0 }
  0xb9   :  { %v247_v32 = vpop.f32.mrf.mxu1  ;;  %v219_v33 = vadd.f32 %v775_v30, %v218_v31  ;;  %v1147_v31 = vld [vmem:[#allocation13 + $0x50] sm:$0xff] }
  0xbb   :  { %v248_v34 = vadd.f32 %v247_v32, %v219_v33  ;;  %v1149_v32 = vld [vmem:[#allocation13 + $0x48] sm:$0xff]  ;;  %v777_v33 = vld [vmem:[%s1240_s6] ss:$0 sm:$0xff] }
  0xbd   :  { %v259_v35 = vmax.f32 %v248_v34, 0.0  ;;  %v1155_v34 = vld [vmem:[#allocation13 + $0x40] sm:$0xff] }
  0xbf   :  { %263 = vst [vmem:[#allocation3 + $0x8] sm:$0xff] %v259_v35  ;;  %352 = vmatmul.f32.vlgmr.msra.gmra.mxu3 %v259_v35 }
  0xc0   :  { %v221_v38 = vpop.f32.mrf.mxu0 }
  0xc1   :  { %v250_v39 = vpop.f32.mrf.mxu1  ;;  %v222_v41 = vadd.f32 %v775_v30, %v221_v38 }
  0xc3   :  { %v251_v45 = vadd.f32 %v250_v39, %v222_v41  ;;  %v1159_v39 = vld [vmem:[#allocation13 + $0x38] sm:$0xff] }
  0xc5   :  { %v260_v47 = vmax.f32 %v251_v45, 0.0 }
  0xc6   :  { %v267_v49 = vld [vmem:[#allocation3 + $0x7] sm:$0xff] }
  0xc7   :  { %264 = vst [vmem:[#allocation3 + $0x10] sm:$0xff] %v260_v47  ;;  %323 = vmatmul.f32.vlgmr.msra.gmra.mxu2 %v267_v49  ;;  %355 = vmatmul.f32.gmra.mxu3 %v260_v47 }
  0xc8   :  { %432 = vst [vmem:[#allocation3] sm:$0xff] %v967_v0  ;;  %v224_v51 = vpop.f32.mrf.mxu0  ;;  %733 = vmatpush.msra.mxu2 %v579_v12 }
  0xc9   :  { %v253_v52 = vpop.f32.mrf.mxu1  ;;  %v225_v53 = vadd.f32 %v775_v30, %v224_v51 }
  0xcb   :  { %v254_v54 = vadd.f32 %v253_v52, %v225_v53  ;;  %v1175_v52 = vld [vmem:[#allocation13 + $0x18] sm:$0xff]  ;;  %v1177_v53 = vld [vmem:[#allocation13 + $0x10] sm:$0xff] }
  0xcd   :  { %v261_v55 = vmax.f32 %v254_v54, 0.0 }
  0xce   :  { %v268_v56 = vld [vmem:[#allocation3 + $0xf] sm:$0xff] }
  0xcf   :  { %265 = vst [vmem:[#allocation3 + $0x20] sm:$0xff] %v261_v55  ;;  %326 = vmatmul.f32.gmra.mxu2 %v268_v56  ;;  %358 = vmatmul.f32.gmra.mxu3 %v261_v55  ;;  %v1180_v55 = vld [vmem:[#allocation13 + $0x8] sm:$0xff] }
  0xd0   :  { %v227_v57 = vpop.f32.mrf.mxu0 }
  0xd1   :  { %v256_v58 = vpop.f32.mrf.mxu1  ;;  %v228_v59 = vadd.f32 %v775_v30, %v227_v57  ;;  %v776_v30 = vld [vmem:[%s1238_s4] ss:$0 sm:$0xff] }
  0xd3   :  { %v257_v60 = vadd.f32 %v256_v58, %v228_v59  ;;  %v1183_v58 = vld [vmem:[#allocation13] sm:$0xff] }
  0xd5   :  { %v262_v61 = vmax.f32 %v257_v60, 0.0 }
  0xd6   :  { %v269_v62 = vld [vmem:[#allocation3 + $0x1f] sm:$0xff] }
  0xd7   :  { %266 = vst [vmem:[#allocation3 + $0x28] sm:$0xff] %v262_v61  ;;  %329 = vmatmul.f32.gmra.mxu2 %v269_v62  ;;  %361 = vmatmul.f32.gmra.mxu3 %v262_v61 }
  0xd8   :  { %433 = vst [vmem:[#allocation3 + $0x18] sm:$0xff] %v967_v0  ;;  %v450_v0 = vld [vmem:[#allocation10 + $0x40] sm:$0xff]  ;;  %v410_v27 = vpop.f32.mrf.mxu0 }
  0xd9   :  { %485 = vmatpush.msrb.mxu1 %v450_v0  ;;  %v411_v38 = vadd.f32 %v777_v33, %v410_v27  ;;  %v560_v27 = vld [vmem:[#allocation12 + $0x60] sm:$0xff] }
  0xdb   :  { %486 = vmatpush.msrb.mxu1 %v449_v11 }
  0xdd   :  { %487 = vmatpush.msrb.mxu1 %v448_v13  ;;  %v578_v13 = vld [vmem:[#allocation12 + $0xf0] sm:$0xff] }
  0xde   :  { %v270_v63 = vld [vmem:[#allocation3 + $0x27] sm:$0xff]  ;;  %614 = vmatpush.msra.mxu0 %v578_v13  ;;  %734 = vmatpush.msra.mxu2 %v578_v13 }
  0xdf   :  { %332 = vmatmul.f32.gmra.mxu2 %v270_v63  ;;  %488 = vmatpush.msrb.mxu1 %v447_v15 }
  0xe0   :  { %v413_v41 = vpop.f32.mrf.mxu0  ;;  %615 = vmatpush.msra.mxu0 %v577_v16  ;;  %735 = vmatpush.msra.mxu2 %v577_v16 }
  0xe1   :  { %489 = vmatpush.msrb.mxu1 %v446_v17  ;;  %v414_v51 = vadd.f32 %v777_v33, %v413_v41  ;;  %v562_v17 = vld [vmem:[#allocation12 + $0x70] sm:$0xff]  ;;  %v571_v41 = vld [vmem:[#allocation12 + $0xb8] sm:$0xff] }
  0xe2   :  { %585 = vmatpush.msrb.mxu3 %v562_v17 }
  0xe3   :  { %490 = vmatpush.msrb.mxu1 %v445_v19 }
  0xe4   :  { %586 = vmatpush.msrb.mxu3 %v561_v18 }
  0xe5   :  { %491 = vmatpush.msrb.mxu1 %v444_v20  ;;  %v576_v20 = vld [vmem:[#allocation12 + $0xe0] sm:$0xff] }
  0xe6   :  { %616 = vmatpush.msra.mxu0 %v576_v20  ;;  %736 = vmatpush.msra.mxu2 %v576_v20 }
  0xe7   :  { %492 = vmatpush.msrb.mxu1 %v443_v21  ;;  %587 = vmatpush.msrb.mxu3 %v560_v27 }
  0xe8   :  { %v416_v56 = vpop.f32.mrf.mxu0 }
  0xe9   :  { %493 = vmatpush.msrb.mxu1 %v442_v22  ;;  %v417_v2 = vadd.f32 %v777_v33, %v416_v56  ;;  %v575_v22 = vld [vmem:[#allocation12 + $0xd8] sm:$0xff]  ;;  %v566_v56 = vld [vmem:[#allocation12 + $0x90] sm:$0xff] }
  0xea   :  { %617 = vmatpush.msra.mxu0 %v575_v22  ;;  %737 = vmatpush.msra.mxu2 %v575_v22 }
  0xeb   :  { %670 = vmatpush.msra.mxu1 %v1129_v23 }
  0xed   :  { %671 = vmatpush.msra.mxu1 %v1132_v24 }
  0xef   :  { %672 = vmatpush.msra.mxu1 %v1135_v25 }
  0xf0   :  { %v419_v6 = vpop.f32.mrf.mxu0 }
  0xf1   :  { %673 = vmatpush.msra.mxu1 %v1138_v26  ;;  %v420_v11 = vadd.f32 %v777_v33, %v419_v6  ;;  %v559_v33 = vld [vmem:[#allocation12 + $0x58] sm:$0xff] }
  0xf2   :  { %588 = vmatpush.msrb.mxu3 %v559_v33 }
  0xf3   :  { %674 = vmatpush.msra.mxu1 %v1141_v28 }
  0xf5   :  { %675 = vmatpush.msra.mxu1 %v1147_v31 }
  0xf7   :  { %676 = vmatpush.msra.mxu1 %v1149_v32 }
  0xf9   :  { %677 = vmatpush.msra.mxu1 %v1155_v34 }
  0xfb   :  { %678 = vmatpush.msra.mxu1 %v1159_v39 }
  0xfd   :  { %679 = vmatpush.msra.mxu1 %v1161_v40 }
  0xff   :  { %680 = vmatpush.msra.mxu1 %v1164_v43 }
 0x101   :  { %681 = vmatpush.msra.mxu1 %v1167_v46 }
 0x103   :  { %682 = vmatpush.msra.mxu1 %v1175_v52 }
 0x105   :  { %683 = vmatpush.msra.mxu1 %v1177_v53 }
 0x107   :  { %684 = vmatpush.msra.mxu1 %v1180_v55 }
 0x109   :  { %685 = vmatpush.msra.mxu1 %v1183_v58 }
 0x142   :  { %v353_v29 = vpop.f32.mrf.mxu3 }
 0x14a   :  { %v324_v35 = vpop.f32.mrf.mxu2  ;;  %v356_v44 = vpop.f32.mrf.mxu3 }
 0x14b   :  { %v325_v36 = vadd.f32 %v776_v30, %v324_v35  ;;  %v573_v35 = vld [vmem:[#allocation12 + $0xc8] sm:$0xff] }
 0x14d   :  { %v354_v37 = vadd.f32 %v353_v29, %v325_v36  ;;  %v558_v36 = vld [vmem:[#allocation12 + $0x50] sm:$0xff] }
 0x14e   :  { %589 = vmatpush.msrb.mxu3 %v558_v36 }
 0x14f   :  { %v365_v42 = vmax.f32 %v354_v37, 0.0  ;;  %v572_v37 = vld [vmem:[#allocation12 + $0xc0] sm:$0xff] }
 0x151   :  { %v422_v45 = vadd.f32 %v411_v38, %v365_v42  ;;  %v557_v38 = vld [vmem:[#allocation12 + $0x48] sm:$0xff]  ;;  %v556_v42 = vld [vmem:[#allocation12 + $0x40] sm:$0xff] }
 0x152   :  { %v327_v47 = vpop.f32.mrf.mxu2  ;;  %v359_v59 = vpop.f32.mrf.mxu3  ;;  %590 = vmatpush.msrb.mxu3 %v557_v38 }
 0x153   :  { %v1170_v48 = vmax.f32 %v422_v45, 0.0  ;;  %v328_v49 = vadd.f32 %v776_v30, %v327_v47  ;;  %v570_v45 = vld [vmem:[#allocation12 + $0xb0] sm:$0xff]  ;;  %v569_v47 = vld [vmem:[#allocation12 + $0xa8] sm:$0xff] }
 0x154   :  { %591 = vmatpush.msrb.mxu3 %v556_v42 }
 0x155   :  { %434 = vst [vmem:[#allocation2 + $0x8] sm:$0xff] %v1170_v48  ;;  %v357_v50 = vadd.f32 %v356_v44, %v328_v49  ;;  %523 = vmatmul.f32.vlgmr.msrb.gmra.mxu2 %v1170_v48  ;;  %v568_v49 = vld [vmem:[#allocation12 + $0xa0] sm:$0xff] }
 0x157   :  { %v366_v54 = vmax.f32 %v357_v50, 0.0  ;;  %v555_v50 = vld [vmem:[#allocation12 + $0x38] sm:$0xff] }
 0x158   :  { %592 = vmatpush.msrb.mxu3 %v555_v50 }
 0x159   :  { %v423_v57 = vadd.f32 %v414_v51, %v366_v54  ;;  %v567_v51 = vld [vmem:[#allocation12 + $0x98] sm:$0xff]  ;;  %v554_v54 = vld [vmem:[#allocation12 + $0x30] sm:$0xff] }
 0x15a   :  { %v330_v60 = vpop.f32.mrf.mxu2  ;;  %v362_v9 = vpop.f32.mrf.mxu3  ;;  %593 = vmatpush.msrb.mxu3 %v554_v54 }
 0x15b   :  { %v331_v61 = vadd.f32 %v776_v30, %v330_v60  ;;  %v1186_v62 = vmax.f32 %v423_v57, 0.0  ;;  %v553_v57 = vld [vmem:[#allocation12 + $0x28] sm:$0xff]  ;;  %v564_v60 = vld [vmem:[#allocation12 + $0x80] sm:$0xff] }
 0x15c   :  { %v438_v63 = vld [vmem:[#allocation2 + $0x6] sm:$0xff]  ;;  %594 = vmatpush.msrb.mxu3 %v553_v57 }
 0x15d   :  { %v360_v1 = vadd.f32 %v359_v59, %v331_v61  ;;  %494 = vmatmul.f32.vlgmr.msrb.gmra.mxu1 %v438_v63  ;;  %435 = vst [vmem:[#allocation2 + $0x10] sm:$0xff] %v1186_v62  ;;  %526 = vmatmul.f32.gmra.mxu2 %v1186_v62  ;;  %v565_v59 = vld [vmem:[#allocation12 + $0x88] sm:$0xff]  ;;  %v551_v61 = vld [vmem:[#allocation12 + $0x18] sm:$0xff] }
 0x15e   :  { %v549_v63 = vld [vmem:[#allocation12 + $0x8] sm:$0xff] }
 0x15f   :  { %v367_v3 = vmax.f32 %v360_v1, 0.0  ;;  %v548_v1 = vld [vmem:[#allocation12] sm:$0xff] }
 0x161   :  { %v424_v4 = vadd.f32 %v417_v2, %v367_v3  ;;  %v778_v2 = vld [vmem:[%s1242_s8] ss:$0 sm:$0xff] }
 0x162   :  { %v333_v5 = vpop.f32.mrf.mxu2 }
 0x163   :  { %v334_v7 = vadd.f32 %v776_v30, %v333_v5  ;;  %v1191_v8 = vmax.f32 %v424_v4, 0.0  ;;  %v574_v30 = vld [vmem:[#allocation12 + $0xd0] sm:$0xff] }
 0x164   :  { %v439_v0 = vld [vmem:[#allocation2 + $0xe] sm:$0xff]  ;;  %618 = vmatpush.msra.mxu0 %v574_v30  ;;  %738 = vmatpush.msra.mxu2 %v574_v30 }
 0x165   :  { %v363_v10 = vadd.f32 %v362_v9, %v334_v7  ;;  %497 = vmatmul.f32.gmra.mxu1 %v439_v0  ;;  %436 = vst [vmem:[#allocation2 + $0x20] sm:$0xff] %v1191_v8  ;;  %529 = vmatmul.f32.gmra.mxu2 %v1191_v8 }
 0x166   :  { %619 = vmatpush.msra.mxu0 %v573_v35  ;;  %739 = vmatpush.msra.mxu2 %v573_v35 }
 0x167   :  { %v368_v15 = vmax.f32 %v363_v10, 0.0 }
 0x168   :  { %620 = vmatpush.msra.mxu0 %v572_v37  ;;  %740 = vmatpush.msra.mxu2 %v572_v37 }
 0x169   :  { %v425_v19 = vadd.f32 %v420_v11, %v368_v15  ;;  %v780_v11 = vld [vmem:[%s1244_s10] ss:$0 sm:$0xff]  ;;  %s968_s10 = smov [#allocation15]  }
 0x16a   :  { %621 = vmatpush.msra.mxu0 %v571_v41  ;;  %741 = vmatpush.msra.mxu2 %v571_v41  ;;  %v779_v15 = vld [vmem:[%s1246_s12] ss:$0 sm:$0xff]  ;;  %s715_s12 = sshll.u32 %s968_s10, 4  ;;  %s716_s12 = int_to_ptr.vmem [resolvable:$true] %s715_s12 }
 0x16b   :  { %v1195_v21 = vmax.f32 %v425_v19, 0.0 }
 0x16c   :  { %v440_v29 = vld [vmem:[#allocation2 + $0x1e] sm:$0xff]  ;;  %622 = vmatpush.msra.mxu0 %v570_v45  ;;  %742 = vmatpush.msra.mxu2 %v570_v45 }
 0x16d   :  { %500 = vmatmul.f32.gmra.mxu1 %v440_v29  ;;  %437 = vst [vmem:[#allocation2 + $0x28] sm:$0xff] %v1195_v21  ;;  %532 = vmatmul.f32.gmra.mxu2 %v1195_v21 }
 0x16e   :  { %623 = vmatpush.msra.mxu0 %v569_v47  ;;  %743 = vmatpush.msra.mxu2 %v569_v47 }
 0x170   :  { %624 = vmatpush.msra.mxu0 %v568_v49  ;;  %744 = vmatpush.msra.mxu2 %v568_v49 }
 0x172   :  { %625 = vmatpush.msra.mxu0 %v567_v51  ;;  %745 = vmatpush.msra.mxu2 %v567_v51 }
 0x174   :  { %v441_v44 = vld [vmem:[#allocation2 + $0x26] sm:$0xff]  ;;  %626 = vmatpush.msra.mxu0 %v566_v56  ;;  %746 = vmatpush.msra.mxu2 %v566_v56 }
 0x175   :  { %503 = vmatmul.f32.gmra.mxu1 %v441_v44 }
 0x176   :  { %627 = vmatpush.msra.mxu0 %v565_v59  ;;  %747 = vmatpush.msra.mxu2 %v565_v59 }
 0x178   :  { %628 = vmatpush.msra.mxu0 %v564_v60  ;;  %748 = vmatpush.msra.mxu2 %v564_v60 }
 0x17d   :  { %686 = vmatmul.f32.vlgmr.msra.gmra.mxu1 %v1170_v48  ;;  %v552_v48 = vld [vmem:[#allocation12 + $0x20] sm:$0xff] }
 0x17e   :  { %595 = vmatpush.msrb.mxu3 %v552_v48 }
 0x180   :  { %596 = vmatpush.msrb.mxu3 %v551_v61 }
 0x185   :  { %689 = vmatmul.f32.gmra.mxu1 %v1186_v62  ;;  %v550_v62 = vld [vmem:[#allocation12 + $0x10] sm:$0xff] }
 0x186   :  { %597 = vmatpush.msrb.mxu3 %v550_v62 }
 0x188   :  { %598 = vmatpush.msrb.mxu3 %v549_v63 }
 0x18a   :  { %599 = vmatpush.msrb.mxu3 %v548_v1 }
 0x18c   :  { %749 = vmatpush.msra.mxu3 %v1129_v23 }
 0x18e   :  { %750 = vmatpush.msra.mxu3 %v1132_v24 }
 0x190   :  { %751 = vmatpush.msra.mxu3 %v1135_v25 }
 0x192   :  { %752 = vmatpush.msra.mxu3 %v1138_v26 }
 0x194   :  { %753 = vmatpush.msra.mxu3 %v1141_v28 }
 0x196   :  { %754 = vmatpush.msra.mxu3 %v1147_v31 }
 0x198   :  { %755 = vmatpush.msra.mxu3 %v1149_v32 }
 0x19a   :  { %756 = vmatpush.msra.mxu3 %v1155_v34 }
 0x19c   :  { %757 = vmatpush.msra.mxu3 %v1159_v39 }
 0x19e   :  { %758 = vmatpush.msra.mxu3 %v1161_v40 }
 0x1a0   :  { %759 = vmatpush.msra.mxu3 %v1164_v43 }
 0x1a2   :  { %760 = vmatpush.msra.mxu3 %v1167_v46 }
 0x1a4   :  { %761 = vmatpush.msra.mxu3 %v1175_v52 }
 0x1a6   :  { %762 = vmatpush.msra.mxu3 %v1177_v53 }
 0x1a8   :  { %763 = vmatpush.msra.mxu3 %v1180_v55 }
 0x1aa   :  { %764 = vmatpush.msra.mxu3 %v1183_v58 }
 0x1d8   :  { %v524_v3 = vpop.f32.mrf.mxu2 }
 0x1da   :  { %v495_v23 = vpop.f32.mrf.mxu1 }
 0x1db   :  { %v496_v24 = vadd.f32 %v778_v2, %v495_v23 }
 0x1dd   :  { %v525_v25 = vadd.f32 %v524_v3, %v496_v24 }
 0x1df   :  { %v536_v26 = vmax.f32 %v525_v25, 0.0 }
 0x1e0   :  { %v527_v28 = vpop.f32.mrf.mxu2 }
 0x1e1   :  { %540 = vst [vmem:[#allocation3 + $0x8] sm:$0xff] %v536_v26  ;;  %629 = vmatmul.f32.vlgmr.msra.gmra.mxu0 %v536_v26 }
 0x1e2   :  { %v498_v31 = vpop.f32.mrf.mxu1 }
 0x1e3   :  { %v499_v32 = vadd.f32 %v778_v2, %v498_v31 }
 0x1e5   :  { %v528_v34 = vadd.f32 %v527_v28, %v499_v32 }
 0x1e7   :  { %v537_v39 = vmax.f32 %v528_v34, 0.0 }
 0x1e8   :  { %v544_v40 = vld [vmem:[#allocation3 + $0x6] sm:$0xff]  ;;  %v530_v43 = vpop.f32.mrf.mxu2 }
 0x1e9   :  { %600 = vmatmul.f32.vlgmr.msrb.gmra.mxu3 %v544_v40  ;;  %541 = vst [vmem:[#allocation3 + $0x10] sm:$0xff] %v537_v39  ;;  %632 = vmatmul.f32.gmra.mxu0 %v537_v39 }
 0x1ea   :  { %v501_v46 = vpop.f32.mrf.mxu1 }
 0x1eb   :  { %v502_v4 = vadd.f32 %v778_v2, %v501_v46 }
 0x1ed   :  { %v531_v5 = vadd.f32 %v530_v43, %v502_v4 }
 0x1ef   :  { %v538_v6 = vmax.f32 %v531_v5, 0.0 }
 0x1f0   :  { %v545_v52 = vld [vmem:[#allocation3 + $0xe] sm:$0xff]  ;;  %v533_v9 = vpop.f32.mrf.mxu2 }
 0x1f1   :  { %542 = vst [vmem:[#allocation3 + $0x20] sm:$0xff] %v538_v6  ;;  %603 = vmatmul.f32.gmra.mxu3 %v545_v52  ;;  %635 = vmatmul.f32.vlgmr.msra.gmra.mxu2 %v538_v6 }
 0x1f2   :  { %v504_v53 = vpop.f32.mrf.mxu1 }
 0x1f3   :  { %v505_v7 = vadd.f32 %v778_v2, %v504_v53 }
 0x1f5   :  { %v534_v55 = vadd.f32 %v533_v9, %v505_v7 }
 0x1f7   :  { %v539_v0 = vmax.f32 %v534_v55, 0.0 }
 0x1f8   :  { %v546_v10 = vld [vmem:[#allocation3 + $0x1e] sm:$0xff] }
 0x1f9   :  { %606 = vmatmul.f32.gmra.mxu3 %v546_v10  ;;  %543 = vst [vmem:[#allocation3 + $0x28] sm:$0xff] %v539_v0  ;;  %638 = vmatmul.f32.gmra.mxu2 %v539_v0 }
 0x1fa   :  { %v687_v12 = vpop.f32.mrf.mxu1 }
 0x1fb   :  { %v688_v18 = vadd.f32 %v779_v15, %v687_v12 }
 0x200   :  { %v547_v58 = vld [vmem:[#allocation3 + $0x26] sm:$0xff] }
 0x201   :  { %609 = vmatmul.f32.gmra.mxu3 %v547_v58 }
 0x209   :  { %692 = vmatmul.f32.vlgmr.msra.gmra.mxu3 %v1191_v8 }
 0x211   :  { %695 = vmatmul.f32.gmra.mxu3 %v1195_v21  ;;  %v690_v21 = vpop.f32.mrf.mxu1 }
 0x212   :  { %v691_v33 = vadd.f32 %v779_v15, %v690_v21 }
 0x25e   :  { %v630_v13 = vpop.f32.mrf.mxu0 }
 0x266   :  { %v633_v29 = vpop.f32.mrf.mxu0 }
 0x26c   :  { %v601_v14 = vpop.f32.mrf.mxu3 }
 0x26d   :  { %v602_v16 = vadd.f32 %v780_v11, %v601_v14 }
 0x26f   :  { %v631_v17 = vadd.f32 %v630_v13, %v602_v16 }
 0x271   :  { %v642_v19 = vmax.f32 %v631_v17, 0.0 }
 0x273   :  { %v699_v20 = vadd.f32 %v688_v18, %v642_v19 }
 0x274   :  { %v604_v22 = vpop.f32.mrf.mxu3  ;;  %v636_v44 = vpop.f32.mrf.mxu2 }
 0x275   :  { %v703_v8 = vmax.f32 %v699_v20, 0.0  ;;  %v605_v27 = vadd.f32 %v780_v11, %v604_v22 }
 0x277   :  { %707 = vst [vmem:[#allocation15] sm:$0xff] %v703_v8  ;;  %v634_v30 = vadd.f32 %v633_v29, %v605_v27 }
 0x279   :  { %v643_v35 = vmax.f32 %v634_v30, 0.0 }
 0x27b   :  { %v700_v36 = vadd.f32 %v691_v33, %v643_v35 }
 0x27c   :  { %v607_v37 = vpop.f32.mrf.mxu3  ;;  %v639_v56 = vpop.f32.mrf.mxu2 }
 0x27d   :  { %v704_v38 = vmax.f32 %v700_v36, 0.0  ;;  %v608_v42 = vadd.f32 %v780_v11, %v607_v37 }
 0x27f   :  { %708 = vst [vmem:[#allocation15 + $0x8] sm:$0xff] %v704_v38  ;;  %v637_v45 = vadd.f32 %v636_v44, %v608_v42 }
 0x281   :  { %v644_v49 = vmax.f32 %v637_v45, 0.0 }
 0x284   :  { %v610_v41 = vpop.f32.mrf.mxu3 }
 0x285   :  { %v611_v50 = vadd.f32 %v780_v11, %v610_v41 }
 0x287   :  { %v640_v57 = vadd.f32 %v639_v56, %v611_v50 }
 0x289   :  { %v645_v60 = vmax.f32 %v640_v57, 0.0 }
 0x28c   :  { %v693_v47 = vpop.f32.mrf.mxu3 }
 0x28d   :  { %v694_v51 = vadd.f32 %v779_v15, %v693_v47 }
 0x28f   :  { %v701_v54 = vadd.f32 %v694_v51, %v644_v49 }
 0x291   :  { %v705_v59 = vmax.f32 %v701_v54, 0.0 }
 0x293   :  { %709 = vst [vmem:[#allocation15 + $0x10] sm:$0xff] %v705_v59 }
 0x294   :  { %v696_v48 = vpop.f32.mrf.mxu3 }
 0x295   :  { %v697_v61 = vadd.f32 %v779_v15, %v696_v48 }
 0x297   :  { %v702_v62 = vadd.f32 %v697_v61, %v645_v60 }
 0x299   :  { %v706_v63 = vmax.f32 %v702_v62, 0.0 }
 0x29b   :  { %710 = vst [vmem:[#allocation15 + $0x18] sm:$0xff] %v706_v63 }
 0x29c   :  { %723 = dma.vmem_to_hbm [thread:$0]  %s716_s12, 512, %s718_s15, [#allocation6], %s960_s16, %s960_s16, %s961_s17  }
 0x29d   :  { %957 = dma.done.wait [#allocation6], 512  }
 0x29e   :  { %958 = vsyncadd [#allocation6], 4294966784 }
 0x29f   :  { %728 = vsyncpa [#allocation5], 1 }
 0x2a0   :  { %729 = vsyncpa [#allocation8], 1 }
 0x2a1   :  { %730 = vsyncpa [#allocation11], 1 }
 0x2a2   :  { %731 = vsyncpa [#allocation14], 1 }
 0x2a3   :  { %732 = vsyncpa [#allocation6], 1 }

// kernel: tpu_custom_call.1
= control target key start
LH: loop header
LB: loop body
LE: loop exit
PB: predicated region body
PF: predicated region fallthrough
CT: control target
= control target key end

     0   :  { %18 = vsyncpa [#allocation5], 0  ;;  %s1234_s0 = inlined_call_operand.vmem [shape: f32[2,16,4], index: 0, kind: input, shape index: {}]   ;;  %s1235_s1 = inlined_call_operand.hbm [shape: f32[256,128], index: 1, kind: input, shape index: {}]   ;;  %s1236_s2 = inlined_call_operand.vmem [shape: f32[1,128], index: 2, kind: input, shape index: {}]   ;;  %s1237_s3 = inlined_call_operand.hbm [shape: f32[256,128], index: 3, kind: input, shape index: {}]   ;;  %s1238_s4 = inlined_call_operand.vmem [shape: f32[1,128], index: 4, kind: input, shape index: {}]   ;;  %s1239_s5 = inlined_call_operand.hbm [shape: f32[128,128], index: 5, kind: input, shape index: {}]   ;;  %s1240_s6 = inlined_call_operand.vmem [shape: f32[1,128], index: 6, kind: input, shape index: {}]   ;;  %s1241_s7 = inlined_call_operand.hbm [shape: f32[256,128], index: 7, kind: input, shape index: {}]   ;;  %s1242_s8 = inlined_call_operand.vmem [shape: f32[1,128], index: 8, kind: input, shape index: {}]   ;;  %s1243_s9 = inlined_call_operand.hbm [shape: f32[256,128], index: 9, kind: input, shape index: {}]   ;;  %s1244_s10 = inlined_call_operand.vmem [shape: f32[1,128], index: 10, kind: input, shape index: {}]   ;;  %s1245_s11 = inlined_call_operand.hbm [shape: f32[128,128], index: 11, kind: input, shape index: {}]   ;;  %s1246_s12 = inlined_call_operand.vmem [shape: f32[1,128], index: 12, kind: input, shape index: {}]   ;;  %s1247_s13 = inlined_call_operand.hbm [shape: f32[2,16,128], index: 13, kind: output, shape index: {}]  }
   0x1   :  { %19 = vsyncpa [#allocation8], 0 }
   0x2   :  { %20 = vsyncpa [#allocation11], 0 }
   0x3   :  { %21 = vsyncpa [#allocation14], 0 }
   0x4   :  { %22 = vsyncpa [#allocation6], 0  ;;  %s44_s27 = sshll.u32 %s1237_s3, 4  ;;  %s959_s28 = smov [#allocation7]   ;;  %s45_s27 = int_to_ptr.hbm [resolvable:$true] %s44_s27 }
   0x5   :  { %s46_s29 = sshll.u32 %s959_s28, 4  ;;  %s74_s15 = sshll.u32 %s1241_s7, 4  ;;  %s47_s29 = int_to_ptr.vmem [resolvable:$true] %s46_s29  ;;  %s75_s15 = int_to_ptr.hbm [resolvable:$true] %s74_s15 }
   0x6   :  { %s960_s16 = smov 128   ;;  %s961_s17 = smov 8  }
   0x7   :  { %52 = dma.hbm_to_vmem [thread:$0]  %s45_s27, 4096, %s47_s29, [#allocation8], %s960_s16, %s960_s16, %s961_s17  }
   0x8   :  { %s962_s18 = smov [#allocation10]   ;;  %s29_s3 = sshll.u32 %s1235_s1, 4  ;;  %s30_s3 = int_to_ptr.hbm [resolvable:$true] %s29_s3 }
   0x9   :  { %s76_s19 = sshll.u32 %s962_s18, 4  ;;  %s59_s23 = sshll.u32 %s1239_s5, 4  ;;  %s77_s19 = int_to_ptr.vmem [resolvable:$true] %s76_s19  ;;  %s60_s23 = int_to_ptr.hbm [resolvable:$true] %s59_s23 }
   0xa   :  { %82 = dma.hbm_to_vmem [thread:$0]  %s75_s15, 4096, %s77_s19, [#allocation11], %s960_s16, %s960_s16, %s961_s17  }
   0xb   :  { %s963_s24 = smov [#allocation4]   ;;  %s964_s26 = smov [#allocation9]  }
   0xc   :  { %s31_s25 = sshll.u32 %s963_s24, 4  ;;  %s61_s1 = sshll.u32 %s964_s26, 4  ;;  %s32_s25 = int_to_ptr.vmem [resolvable:$true] %s31_s25  ;;  %s62_s1 = int_to_ptr.vmem [resolvable:$true] %s61_s1 }
   0xd   :  { %37 = dma.hbm_to_vmem [thread:$0]  %s30_s3, 4096, %s32_s25, [#allocation5], %s960_s16, %s960_s16, %s961_s17  }
   0xe   :  { %s89_s29 = sshll.u32 %s1243_s9, 4  ;;  %s104_s14 = sshll.u32 %s1245_s11, 4  ;;  %s90_s29 = int_to_ptr.hbm [resolvable:$true] %s89_s29  ;;  %s105_s14 = int_to_ptr.hbm [resolvable:$true] %s104_s14 }
   0xf   :  { %67 = dma.hbm_to_vmem [thread:$0]  %s60_s23, 2048, %s62_s1, [#allocation8], %s960_s16, %s960_s16, %s961_s17  }
  0x10   :  { %s965_s15 = smov [#allocation12]   ;;  %s966_s19 = smov [#allocation13]  }
  0x11   :  { %s91_s18 = sshll.u32 %s965_s15, 4  ;;  %s106_s9 = sshll.u32 %s966_s19, 4  ;;  %s92_s18 = int_to_ptr.vmem [resolvable:$true] %s91_s18  ;;  %s107_s9 = int_to_ptr.vmem [resolvable:$true] %s106_s9 }
  0x12   :  { %97 = dma.hbm_to_vmem [thread:$0]  %s90_s29, 4096, %s92_s18, [#allocation11], %s960_s16, %s960_s16, %s961_s17  }
  0x13   :  { %112 = dma.hbm_to_vmem [thread:$0]  %s105_s14, 2048, %s107_s9, [#allocation14], %s960_s16, %s960_s16, %s961_s17  }
  0x14   :  { %949 = dma.done.wait [#allocation5], 4096  }
  0x15   :  { %950 = vsyncadd [#allocation5], 4294963200 }
  0x16   :  { %951 = dma.done.wait [#allocation8], 6144  }
  0x17   :  { %952 = vsyncadd [#allocation8], 4294961152 }
  0x18   :  { %953 = dma.done.wait [#allocation11], 8192  }
  0x19   :  { %954 = vsyncadd [#allocation11], 4294959104 }
  0x1a   :  { %955 = dma.done.wait [#allocation14], 2048  }
  0x1b   :  { %956 = vsyncadd [#allocation14], 4294965248  ;;  %v967_v0 = vmov 0.0   ;;  %v180_v1 = vld [vmem:[#allocation4 + $0x78] sm:$0xff]  ;;  %v179_v2 = vld [vmem:[#allocation4 + $0x70] sm:$0xff]  ;;  %vm147_vm0 = vcmask 31744  }
  0x1c   :  { %139 = vst [vmem:[#allocation2] sm:$0xff] %v967_v0  ;;  %v196_v3 = vld [vmem:[#allocation4 + $0xf8] sm:$0xff]  ;;  %201 = vmatpush.msra.mxu0 %v180_v1  ;;  %v195_v4 = vld [vmem:[#allocation4 + $0xf0] sm:$0xff]  ;;  %v178_v5 = vld [vmem:[#allocation4 + $0x68] sm:$0xff]  ;;  %vm152_vm1 = vcmask 1047584   ;;  %s717_s15 = sshll.u32 %s1247_s13, 4  ;;  %s718_s15 = int_to_ptr.hbm [resolvable:$true] %s717_s15 }
  0x1d   :  { %140 = vst [vmem:[#allocation2 + $0x18] sm:$0xff] %v967_v0  ;;  %230 = vmatpush.msra.mxu1 %v196_v3  ;;  %v194_v6 = vld [vmem:[#allocation4 + $0xe8] sm:$0xff]  ;;  %v177_v7 = vld [vmem:[#allocation4 + $0x60] sm:$0xff]  ;;  %v176_v9 = vld [vmem:[#allocation4 + $0x58] sm:$0xff] }
  0x1e   :  { %141 = vst [vmem:[#allocation3] sm:$0xff] %v967_v0  ;;  %202 = vmatpush.msra.mxu0 %v179_v2  ;;  %v193_v8 = vld [vmem:[#allocation4 + $0xe0] sm:$0xff]  ;;  %v192_v10 = vld [vmem:[#allocation4 + $0xd8] sm:$0xff]  ;;  %v175_v11 = vld [vmem:[#allocation4 + $0x50] sm:$0xff] }
  0x1f   :  { %142 = vst [vmem:[#allocation3 + $0x18] sm:$0xff] %v967_v0  ;;  %231 = vmatpush.msra.mxu1 %v195_v4  ;;  %v191_v12 = vld [vmem:[#allocation4 + $0xd0] sm:$0xff]  ;;  %v174_v13 = vld [vmem:[#allocation4 + $0x48] sm:$0xff]  ;;  %v173_v14 = vld [vmem:[#allocation4 + $0x40] sm:$0xff] }
  0x20   :  { %203 = vmatpush.msra.mxu0 %v178_v5  ;;  %v190_v15 = vld [vmem:[#allocation4 + $0xc8] sm:$0xff]  ;;  %v143_v16 = vld [vmem:[%s1234_s0] sm:$0xff]  ;;  %v145_v19 = vld [vmem:[%s1234_s0 + $0x10] sm:$0xff] }
  0x21   :  { %232 = vmatpush.msra.mxu1 %v194_v6  ;;  %v189_v17 = vld [vmem:[#allocation4 + $0xc0] sm:$0xff]  ;;  %148 = vst.msk [vmem:[#allocation2 + $0x8] sm:$0xff] %vm147_vm0, %v143_v16  ;;  %v144_v18 = vld [vmem:[%s1234_s0 + $0x8] sm:$0xff]  ;;  %v172_v20 = vld [vmem:[#allocation4 + $0x38] sm:$0xff] }
  0x22   :  { %204 = vmatpush.msra.mxu0 %v177_v7  ;;  %153 = vst.msk [vmem:[#allocation2 + $0x8] sm:$0xff] %vm152_vm1, %v967_v0  ;;  %v188_v21 = vld [vmem:[#allocation4 + $0xb8] sm:$0xff]  ;;  %v171_v23 = vld [vmem:[#allocation4 + $0x30] sm:$0xff]  ;;  %v170_v25 = vld [vmem:[#allocation4 + $0x28] sm:$0xff] }
  0x23   :  { %233 = vmatpush.msra.mxu1 %v193_v8  ;;  %149 = vst.msk [vmem:[#allocation2 + $0x10] sm:$0xff] %vm147_vm0, %v144_v18  ;;  %v146_v22 = vld [vmem:[%s1234_s0 + $0x18] sm:$0xff]  ;;  %v187_v24 = vld [vmem:[#allocation4 + $0xb0] sm:$0xff]  ;;  %v186_v26 = vld [vmem:[#allocation4 + $0xa8] sm:$0xff] }
  0x24   :  { %205 = vmatpush.msra.mxu0 %v176_v9  ;;  %154 = vst.msk [vmem:[#allocation2 + $0x10] sm:$0xff] %vm152_vm1, %v967_v0  ;;  %v169_v28 = vld [vmem:[#allocation4 + $0x20] sm:$0xff]  ;;  %v168_v30 = vld [vmem:[#allocation4 + $0x18] sm:$0xff]  ;;  %v167_v33 = vld [vmem:[#allocation4 + $0x10] sm:$0xff] }
  0x25   :  { %234 = vmatpush.msra.mxu1 %v192_v10  ;;  %150 = vst.msk [vmem:[#allocation2 + $0x20] sm:$0xff] %vm147_vm0, %v145_v19  ;;  %v185_v29 = vld [vmem:[#allocation4 + $0xa0] sm:$0xff]  ;;  %v184_v31 = vld [vmem:[#allocation4 + $0x98] sm:$0xff]  ;;  %v183_v34 = vld [vmem:[#allocation4 + $0x90] sm:$0xff] }
  0x26   :  { %206 = vmatpush.msra.mxu0 %v175_v11  ;;  %155 = vst.msk [vmem:[#allocation2 + $0x20] sm:$0xff] %vm152_vm1, %v967_v0  ;;  %v302_v35 = vld [vmem:[#allocation7 + $0xf8] sm:$0xff]  ;;  %v301_v36 = vld [vmem:[#allocation7 + $0xf0] sm:$0xff]  ;;  %v166_v37 = vld [vmem:[#allocation4 + $0x8] sm:$0xff] }
  0x27   :  { %235 = vmatpush.msra.mxu1 %v191_v12  ;;  %151 = vst.msk [vmem:[#allocation2 + $0x28] sm:$0xff] %vm147_vm0, %v146_v22  ;;  %v182_v38 = vld [vmem:[#allocation4 + $0x88] sm:$0xff]  ;;  %336 = vmatpush.msra.mxu3 %v302_v35  ;;  %v286_v39 = vld [vmem:[#allocation7 + $0x78] sm:$0xff]  ;;  %v285_v41 = vld [vmem:[#allocation7 + $0x70] sm:$0xff] }
  0x28   :  { %207 = vmatpush.msra.mxu0 %v174_v13  ;;  %156 = vst.msk [vmem:[#allocation2 + $0x28] sm:$0xff] %vm152_vm1, %v967_v0  ;;  %v300_v40 = vld [vmem:[#allocation7 + $0xe8] sm:$0xff]  ;;  %v165_v42 = vld [vmem:[#allocation4] sm:$0xff]  ;;  %307 = vmatpush.msra.mxu2 %v286_v39  ;;  %v388_v47 = vld [vmem:[#allocation9 + $0x78] sm:$0xff] }
  0x29   :  { %236 = vmatpush.msra.mxu1 %v190_v15  ;;  %v157_v27 = vld [vmem:[#allocation2 + $0x7] sm:$0xff]  ;;  %337 = vmatpush.msra.mxu3 %v301_v36  ;;  %v298_v48 = vld [vmem:[#allocation7 + $0xd8] sm:$0xff]  ;;  %v387_v50 = vld [vmem:[#allocation9 + $0x70] sm:$0xff] }
  0x2a   :  { %208 = vmatpush.msra.mxu0 %v173_v14  ;;  %430 = vst [vmem:[#allocation2] sm:$0xff] %v967_v0  ;;  %v181_v43 = vld [vmem:[#allocation4 + $0x80] sm:$0xff]  ;;  %v1107_v44 = vld [vmem:[#allocation2 + $0x8] sm:$0xff]  ;;  %308 = vmatpush.msra.mxu2 %v285_v41  ;;  %v297_v51 = vld [vmem:[#allocation7 + $0xd0] sm:$0xff] }
  0x2b   :  { %237 = vmatpush.msra.mxu1 %v189_v17  ;;  %338 = vmatpush.msra.mxu3 %v300_v40  ;;  %v299_v45 = vld [vmem:[#allocation7 + $0xe0] sm:$0xff]  ;;  %v284_v46 = vld [vmem:[#allocation7 + $0x68] sm:$0xff]  ;;  %v282_v52 = vld [vmem:[#allocation7 + $0x58] sm:$0xff] }
  0x2c   :  { %209 = vmatpush.msra.mxu0 %v172_v20  ;;  %v283_v49 = vld [vmem:[#allocation7 + $0x60] sm:$0xff]  ;;  %309 = vmatpush.msra.mxu2 %v284_v46  ;;  %v386_v53 = vld [vmem:[#allocation9 + $0x68] sm:$0xff]  ;;  %v281_v55 = vld [vmem:[#allocation7 + $0x50] sm:$0xff] }
  0x2d   :  { %238 = vmatpush.msra.mxu1 %v188_v21  ;;  %v1104_v32 = vld [vmem:[#allocation2 + $0x1f] sm:$0xff]  ;;  %339 = vmatpush.msra.mxu3 %v299_v45  ;;  %v296_v54 = vld [vmem:[#allocation7 + $0xc8] sm:$0xff]  ;;  %v1110_v57 = vld [vmem:[#allocation2 + $0x10] sm:$0xff] }
  0x2e   :  { %210 = vmatpush.msra.mxu0 %v171_v23  ;;  %431 = vst [vmem:[#allocation2 + $0x18] sm:$0xff] %v967_v0  ;;  %310 = vmatpush.msra.mxu2 %v283_v49  ;;  %v158_v56 = vld [vmem:[#allocation2 + $0xf] sm:$0xff]  ;;  %v295_v58 = vld [vmem:[#allocation7 + $0xc0] sm:$0xff]  ;;  %v294_v61 = vld [vmem:[#allocation7 + $0xb8] sm:$0xff] }
  0x2f   :  { %239 = vmatpush.msra.mxu1 %v187_v24  ;;  %340 = vmatpush.msra.mxu3 %v298_v48  ;;  %v280_v59 = vld [vmem:[#allocation7 + $0x48] sm:$0xff]  ;;  %v385_v60 = vld [vmem:[#allocation9 + $0x60] sm:$0xff]  ;;  %v293_v63 = vld [vmem:[#allocation7 + $0xb0] sm:$0xff] }
  0x30   :  { %211 = vmatpush.msra.mxu0 %v170_v25  ;;  %311 = vmatpush.msra.mxu2 %v282_v52  ;;  %v279_v62 = vld [vmem:[#allocation7 + $0x40] sm:$0xff]  ;;  %v292_v1 = vld [vmem:[#allocation7 + $0xa8] sm:$0xff]  ;;  %v278_v6 = vld [vmem:[#allocation7 + $0x38] sm:$0xff] }
  0x31   :  { %240 = vmatpush.msra.mxu1 %v186_v26  ;;  %341 = vmatpush.msra.mxu3 %v297_v51  ;;  %v1113_v2 = vld [vmem:[#allocation2 + $0x20] sm:$0xff]  ;;  %v1117_v5 = vld [vmem:[#allocation2 + $0x28] sm:$0xff]  ;;  %v290_v7 = vld [vmem:[#allocation7 + $0x98] sm:$0xff] }
  0x32   :  { %212 = vmatpush.msra.mxu0 %v169_v28  ;;  %312 = vmatpush.msra.mxu2 %v281_v55  ;;  %v291_v3 = vld [vmem:[#allocation7 + $0xa0] sm:$0xff]  ;;  %v384_v8 = vld [vmem:[#allocation9 + $0x58] sm:$0xff]  ;;  %v277_v9 = vld [vmem:[#allocation7 + $0x30] sm:$0xff] }
  0x33   :  { %241 = vmatpush.msra.mxu1 %v185_v29  ;;  %342 = vmatpush.msra.mxu3 %v296_v54  ;;  %v160_v4 = vld [vmem:[#allocation2 + $0x27] sm:$0xff]  ;;  %v289_v10 = vld [vmem:[#allocation7 + $0x90] sm:$0xff]  ;;  %v274_v18 = vld [vmem:[#allocation7 + $0x18] sm:$0xff] }
  0x34   :  { %213 = vmatpush.msra.mxu0 %v168_v30  ;;  %313 = vmatpush.msra.mxu2 %v280_v59  ;;  %v383_v11 = vld [vmem:[#allocation9 + $0x50] sm:$0xff]  ;;  %v276_v12 = vld [vmem:[#allocation7 + $0x28] sm:$0xff]  ;;  %v275_v15 = vld [vmem:[#allocation7 + $0x20] sm:$0xff] }
  0x35   :  { %242 = vmatpush.msra.mxu1 %v184_v31  ;;  %343 = vmatpush.msra.mxu3 %v295_v58  ;;  %v288_v13 = vld [vmem:[#allocation7 + $0x88] sm:$0xff]  ;;  %v287_v16 = vld [vmem:[#allocation7 + $0x80] sm:$0xff]  ;;  %v380_v19 = vld [vmem:[#allocation9 + $0x38] sm:$0xff] }
  0x36   :  { %214 = vmatpush.msra.mxu0 %v167_v33  ;;  %314 = vmatpush.msra.mxu2 %v279_v62  ;;  %v382_v14 = vld [vmem:[#allocation9 + $0x48] sm:$0xff]  ;;  %v381_v17 = vld [vmem:[#allocation9 + $0x40] sm:$0xff]  ;;  %v273_v20 = vld [vmem:[#allocation7 + $0x10] sm:$0xff] }
  0x37   :  { %243 = vmatpush.msra.mxu1 %v183_v34  ;;  %344 = vmatpush.msra.mxu3 %v294_v61  ;;  %v379_v21 = vld [vmem:[#allocation9 + $0x30] sm:$0xff]  ;;  %v272_v22 = vld [vmem:[#allocation7 + $0x8] sm:$0xff]  ;;  %v271_v24 = vld [vmem:[#allocation7] sm:$0xff] }
  0x38   :  { %215 = vmatpush.msra.mxu0 %v166_v37  ;;  %315 = vmatpush.msra.mxu2 %v278_v6  ;;  %v378_v23 = vld [vmem:[#allocation9 + $0x28] sm:$0xff]  ;;  %v377_v25 = vld [vmem:[#allocation9 + $0x20] sm:$0xff]  ;;  %v376_v26 = vld [vmem:[#allocation9 + $0x18] sm:$0xff] }
  0x39   :  { %244 = vmatpush.msra.mxu1 %v182_v38  ;;  %345 = vmatpush.msra.mxu3 %v293_v63  ;;  %v374_v28 = vld [vmem:[#allocation9 + $0x8] sm:$0xff]  ;;  %v373_v29 = vld [vmem:[#allocation9] sm:$0xff]  ;;  %v473_v36 = vld [vmem:[#allocation10 + $0xf8] sm:$0xff] }
  0x3a   :  { %216 = vmatpush.msra.mxu0 %v165_v42  ;;  %316 = vmatpush.msra.mxu2 %v277_v9  ;;  %v775_v30 = vld [vmem:[%s1236_s2] ss:$0 sm:$0xff]  ;;  %v472_v37 = vld [vmem:[#allocation10 + $0xf0] sm:$0xff]  ;;  %v457_v40 = vld [vmem:[#allocation10 + $0x78] sm:$0xff] }
  0x3b   :  { %245 = vmatpush.msra.mxu1 %v181_v43  ;;  %217 = vmatmul.f32.vlgmr.msra.gmra.mxu0 %v157_v27  ;;  %v375_v27 = vld [vmem:[#allocation9 + $0x10] sm:$0xff]  ;;  %v471_v42 = vld [vmem:[#allocation10 + $0xe8] sm:$0xff]  ;;  %v470_v46 = vld [vmem:[#allocation10 + $0xe0] sm:$0xff] }
  0x3c   :  { %246 = vmatmul.f32.vlgmr.msra.gmra.mxu1 %v1107_v44  ;;  %393 = vmatpush.msrb.mxu0 %v388_v47  ;;  %v456_v43 = vld [vmem:[#allocation10 + $0x70] sm:$0xff]  ;;  %v469_v48 = vld [vmem:[#allocation10 + $0xd8] sm:$0xff]  ;;  %v463_v9 = vld [vmem:[#allocation10 + $0xa8] sm:$0xff] }
  0x3d   :  { %346 = vmatpush.msra.mxu3 %v292_v1  ;;  %317 = vmatpush.msra.mxu2 %v276_v12  ;;  %v467_v1 = vld [vmem:[#allocation10 + $0xc8] sm:$0xff]  ;;  %v452_v6 = vld [vmem:[#allocation10 + $0x50] sm:$0xff]  ;;  %v461_v12 = vld [vmem:[#allocation10 + $0x98] sm:$0xff] }
  0x3e   :  { %394 = vmatpush.msrb.mxu0 %v387_v50  ;;  %478 = vmatpush.msrb.mxu1 %v457_v40  ;;  %v468_v50 = vld [vmem:[#allocation10 + $0xd0] sm:$0xff] }
  0x3f   :  { %347 = vmatpush.msra.mxu3 %v291_v3  ;;  %318 = vmatpush.msra.mxu2 %v275_v15  ;;  %v466_v3 = vld [vmem:[#allocation10 + $0xc0] sm:$0xff]  ;;  %v447_v15 = vld [vmem:[#allocation10 + $0x28] sm:$0xff]  ;;  %v1161_v40 = vld [vmem:[#allocation13 + $0x30] sm:$0xff] }
  0x40   :  { %395 = vmatpush.msrb.mxu0 %v386_v53  ;;  %479 = vmatpush.msrb.mxu1 %v456_v43  ;;  %v1164_v43 = vld [vmem:[#allocation13 + $0x28] sm:$0xff] }
  0x41   :  { %348 = vmatpush.msra.mxu3 %v290_v7  ;;  %319 = vmatpush.msra.mxu2 %v274_v18  ;;  %v464_v7 = vld [vmem:[#allocation10 + $0xb0] sm:$0xff]  ;;  %v458_v18 = vld [vmem:[#allocation10 + $0x80] sm:$0xff] }
  0x42   :  { %396 = vmatpush.msrb.mxu0 %v385_v60 }
  0x43   :  { %220 = vmatmul.f32.gmra.mxu0 %v158_v56  ;;  %349 = vmatpush.msra.mxu3 %v289_v10  ;;  %v462_v10 = vld [vmem:[#allocation10 + $0xa0] sm:$0xff] }
  0x44   :  { %249 = vmatmul.f32.gmra.mxu1 %v1110_v57  ;;  %397 = vmatpush.msrb.mxu0 %v384_v8  ;;  %v451_v8 = vld [vmem:[#allocation10 + $0x48] sm:$0xff] }
  0x45   :  { %350 = vmatpush.msra.mxu3 %v288_v13  ;;  %320 = vmatpush.msra.mxu2 %v273_v20  ;;  %v448_v13 = vld [vmem:[#allocation10 + $0x30] sm:$0xff] }
  0x46   :  { %398 = vmatpush.msrb.mxu0 %v383_v11  ;;  %v449_v11 = vld [vmem:[#allocation10 + $0x38] sm:$0xff]  ;;  %v444_v20 = vld [vmem:[#allocation10 + $0x10] sm:$0xff] }
  0x47   :  { %351 = vmatpush.msra.mxu3 %v287_v16  ;;  %321 = vmatpush.msra.mxu2 %v272_v22  ;;  %v459_v16 = vld [vmem:[#allocation10 + $0x88] sm:$0xff]  ;;  %v442_v22 = vld [vmem:[#allocation10] sm:$0xff] }
  0x48   :  { %399 = vmatpush.msrb.mxu0 %v382_v14  ;;  %v460_v14 = vld [vmem:[#allocation10 + $0x90] sm:$0xff] }
  0x49   :  { %322 = vmatpush.msra.mxu2 %v271_v24  ;;  %v1132_v24 = vld [vmem:[#allocation13 + $0x70] sm:$0xff] }
  0x4a   :  { %400 = vmatpush.msrb.mxu0 %v381_v17  ;;  %v446_v17 = vld [vmem:[#allocation10 + $0x20] sm:$0xff] }
  0x4b   :  { %223 = vmatmul.f32.gmra.mxu0 %v1104_v32  ;;  %507 = vmatpush.msrb.mxu2 %v473_v36 }
  0x4c   :  { %252 = vmatmul.f32.gmra.mxu1 %v1113_v2  ;;  %401 = vmatpush.msrb.mxu0 %v380_v19  ;;  %v445_v19 = vld [vmem:[#allocation10 + $0x18] sm:$0xff] }
  0x4d   :  { %508 = vmatpush.msrb.mxu2 %v472_v37 }
  0x4e   :  { %402 = vmatpush.msrb.mxu0 %v379_v21  ;;  %v443_v21 = vld [vmem:[#allocation10 + $0x8] sm:$0xff] }
  0x4f   :  { %509 = vmatpush.msrb.mxu2 %v471_v42 }
  0x50   :  { %403 = vmatpush.msrb.mxu0 %v378_v23  ;;  %v1129_v23 = vld [vmem:[#allocation13 + $0x78] sm:$0xff] }
  0x51   :  { %510 = vmatpush.msrb.mxu2 %v470_v46  ;;  %v1167_v46 = vld [vmem:[#allocation13 + $0x20] sm:$0xff] }
  0x52   :  { %404 = vmatpush.msrb.mxu0 %v377_v25  ;;  %v1135_v25 = vld [vmem:[#allocation13 + $0x68] sm:$0xff] }
  0x53   :  { %226 = vmatmul.f32.gmra.mxu0 %v160_v4  ;;  %511 = vmatpush.msrb.mxu2 %v469_v48  ;;  %v453_v4 = vld [vmem:[#allocation10 + $0x58] sm:$0xff] }
  0x54   :  { %255 = vmatmul.f32.gmra.mxu1 %v1117_v5  ;;  %405 = vmatpush.msrb.mxu0 %v376_v26  ;;  %v1138_v26 = vld [vmem:[#allocation13 + $0x60] sm:$0xff] }
  0x55   :  { %512 = vmatpush.msrb.mxu2 %v468_v50 }
  0x56   :  { %406 = vmatpush.msrb.mxu0 %v375_v27 }
  0x57   :  { %513 = vmatpush.msrb.mxu2 %v467_v1 }
  0x58   :  { %407 = vmatpush.msrb.mxu0 %v374_v28  ;;  %v1141_v28 = vld [vmem:[#allocation13 + $0x58] sm:$0xff] }
  0x59   :  { %514 = vmatpush.msrb.mxu2 %v466_v3 }
  0x5a   :  { %408 = vmatpush.msrb.mxu0 %v373_v29 }
  0x5b   :  { %409 = vmatmul.f32.vlgmr.msrb.gmra.mxu0 %v1107_v44  ;;  %v455_v44 = vld [vmem:[#allocation10 + $0x68] sm:$0xff] }
  0x5c   :  { %480 = vmatpush.msrb.mxu1 %v455_v44 }
  0x63   :  { %412 = vmatmul.f32.gmra.mxu0 %v1110_v57 }
  0x6b   :  { %415 = vmatmul.f32.gmra.mxu0 %v1113_v2  ;;  %v454_v2 = vld [vmem:[#allocation10 + $0x60] sm:$0xff] }
  0x6c   :  { %481 = vmatpush.msrb.mxu1 %v454_v2 }
  0x6e   :  { %482 = vmatpush.msrb.mxu1 %v453_v4 }
  0x70   :  { %483 = vmatpush.msrb.mxu1 %v452_v6 }
  0x72   :  { %484 = vmatpush.msrb.mxu1 %v451_v8 }
  0x73   :  { %418 = vmatmul.f32.gmra.mxu0 %v1117_v5  ;;  %v465_v5 = vld [vmem:[#allocation10 + $0xb8] sm:$0xff] }
  0x74   :  { %515 = vmatpush.msrb.mxu2 %v465_v5 }
  0x76   :  { %516 = vmatpush.msrb.mxu2 %v464_v7 }
  0x78   :  { %517 = vmatpush.msrb.mxu2 %v463_v9 }
  0x7a   :  { %518 = vmatpush.msrb.mxu2 %v462_v10 }
  0x7c   :  { %519 = vmatpush.msrb.mxu2 %v461_v12  ;;  %v579_v12 = vld [vmem:[#allocation12 + $0xf8] sm:$0xff] }
  0x7d   :  { %613 = vmatpush.msra.mxu0 %v579_v12 }
  0x7e   :  { %520 = vmatpush.msrb.mxu2 %v460_v14  ;;  %v563_v14 = vld [vmem:[#allocation12 + $0x78] sm:$0xff] }
  0x7f   :  { %584 = vmatpush.msrb.mxu3 %v563_v14 }
  0x80   :  { %521 = vmatpush.msrb.mxu2 %v459_v16  ;;  %v577_v16 = vld [vmem:[#allocation12 + $0xe8] sm:$0xff] }
  0x82   :  { %522 = vmatpush.msrb.mxu2 %v458_v18  ;;  %v561_v18 = vld [vmem:[#allocation12 + $0x68] sm:$0xff] }
  0xb8   :  { %v218_v31 = vpop.f32.mrf.mxu0 }
  0xb9   :  { %v247_v32 = vpop.f32.mrf.mxu1  ;;  %v219_v33 = vadd.f32 %v775_v30, %v218_v31  ;;  %v1147_v31 = vld [vmem:[#allocation13 + $0x50] sm:$0xff] }
  0xbb   :  { %v248_v34 = vadd.f32 %v247_v32, %v219_v33  ;;  %v1149_v32 = vld [vmem:[#allocation13 + $0x48] sm:$0xff]  ;;  %v777_v33 = vld [vmem:[%s1240_s6] ss:$0 sm:$0xff] }
  0xbd   :  { %v259_v35 = vmax.f32 %v248_v34, 0.0  ;;  %v1155_v34 = vld [vmem:[#allocation13 + $0x40] sm:$0xff] }
  0xbf   :  { %263 = vst [vmem:[#allocation3 + $0x8] sm:$0xff] %v259_v35  ;;  %352 = vmatmul.f32.vlgmr.msra.gmra.mxu3 %v259_v35 }
  0xc0   :  { %v221_v38 = vpop.f32.mrf.mxu0 }
  0xc1   :  { %v250_v39 = vpop.f32.mrf.mxu1  ;;  %v222_v41 = vadd.f32 %v775_v30, %v221_v38 }
  0xc3   :  { %v251_v45 = vadd.f32 %v250_v39, %v222_v41  ;;  %v1159_v39 = vld [vmem:[#allocation13 + $0x38] sm:$0xff] }
  0xc5   :  { %v260_v47 = vmax.f32 %v251_v45, 0.0 }
  0xc6   :  { %v267_v49 = vld [vmem:[#allocation3 + $0x7] sm:$0xff] }
  0xc7   :  { %264 = vst [vmem:[#allocation3 + $0x10] sm:$0xff] %v260_v47  ;;  %323 = vmatmul.f32.vlgmr.msra.gmra.mxu2 %v267_v49  ;;  %355 = vmatmul.f32.gmra.mxu3 %v260_v47 }
  0xc8   :  { %432 = vst [vmem:[#allocation3] sm:$0xff] %v967_v0  ;;  %v224_v51 = vpop.f32.mrf.mxu0  ;;  %733 = vmatpush.msra.mxu2 %v579_v12 }
  0xc9   :  { %v253_v52 = vpop.f32.mrf.mxu1  ;;  %v225_v53 = vadd.f32 %v775_v30, %v224_v51 }
  0xcb   :  { %v254_v54 = vadd.f32 %v253_v52, %v225_v53  ;;  %v1175_v52 = vld [vmem:[#allocation13 + $0x18] sm:$0xff]  ;;  %v1177_v53 = vld [vmem:[#allocation13 + $0x10] sm:$0xff] }
  0xcd   :  { %v261_v55 = vmax.f32 %v254_v54, 0.0 }
  0xce   :  { %v268_v56 = vld [vmem:[#allocation3 + $0xf] sm:$0xff] }
  0xcf   :  { %265 = vst [vmem:[#allocation3 + $0x20] sm:$0xff] %v261_v55  ;;  %326 = vmatmul.f32.gmra.mxu2 %v268_v56  ;;  %358 = vmatmul.f32.gmra.mxu3 %v261_v55  ;;  %v1180_v55 = vld [vmem:[#allocation13 + $0x8] sm:$0xff] }
  0xd0   :  { %v227_v57 = vpop.f32.mrf.mxu0 }
  0xd1   :  { %v256_v58 = vpop.f32.mrf.mxu1  ;;  %v228_v59 = vadd.f32 %v775_v30, %v227_v57  ;;  %v776_v30 = vld [vmem:[%s1238_s4] ss:$0 sm:$0xff] }
  0xd3   :  { %v257_v60 = vadd.f32 %v256_v58, %v228_v59  ;;  %v1183_v58 = vld [vmem:[#allocation13] sm:$0xff] }
  0xd5   :  { %v262_v61 = vmax.f32 %v257_v60, 0.0 }
  0xd6   :  { %v269_v62 = vld [vmem:[#allocation3 + $0x1f] sm:$0xff] }
  0xd7   :  { %266 = vst [vmem:[#allocation3 + $0x28] sm:$0xff] %v262_v61  ;;  %329 = vmatmul.f32.gmra.mxu2 %v269_v62  ;;  %361 = vmatmul.f32.gmra.mxu3 %v262_v61 }
  0xd8   :  { %433 = vst [vmem:[#allocation3 + $0x18] sm:$0xff] %v967_v0  ;;  %v450_v0 = vld [vmem:[#allocation10 + $0x40] sm:$0xff]  ;;  %v410_v27 = vpop.f32.mrf.mxu0 }
  0xd9   :  { %485 = vmatpush.msrb.mxu1 %v450_v0  ;;  %v411_v38 = vadd.f32 %v777_v33, %v410_v27  ;;  %v560_v27 = vld [vmem:[#allocation12 + $0x60] sm:$0xff] }
  0xdb   :  { %486 = vmatpush.msrb.mxu1 %v449_v11 }
  0xdd   :  { %487 = vmatpush.msrb.mxu1 %v448_v13  ;;  %v578_v13 = vld [vmem:[#allocation12 + $0xf0] sm:$0xff] }
  0xde   :  { %v270_v63 = vld [vmem:[#allocation3 + $0x27] sm:$0xff]  ;;  %614 = vmatpush.msra.mxu0 %v578_v13  ;;  %734 = vmatpush.msra.mxu2 %v578_v13 }
  0xdf   :  { %332 = vmatmul.f32.gmra.mxu2 %v270_v63  ;;  %488 = vmatpush.msrb.mxu1 %v447_v15 }
  0xe0   :  { %v413_v41 = vpop.f32.mrf.mxu0  ;;  %615 = vmatpush.msra.mxu0 %v577_v16  ;;  %735 = vmatpush.msra.mxu2 %v577_v16 }
  0xe1   :  { %489 = vmatpush.msrb.mxu1 %v446_v17  ;;  %v414_v51 = vadd.f32 %v777_v33, %v413_v41  ;;  %v562_v17 = vld [vmem:[#allocation12 + $0x70] sm:$0xff]  ;;  %v571_v41 = vld [vmem:[#allocation12 + $0xb8] sm:$0xff] }
  0xe2   :  { %585 = vmatpush.msrb.mxu3 %v562_v17 }
  0xe3   :  { %490 = vmatpush.msrb.mxu1 %v445_v19 }
  0xe4   :  { %586 = vmatpush.msrb.mxu3 %v561_v18 }
  0xe5   :  { %491 = vmatpush.msrb.mxu1 %v444_v20  ;;  %v576_v20 = vld [vmem:[#allocation12 + $0xe0] sm:$0xff] }
  0xe6   :  { %616 = vmatpush.msra.mxu0 %v576_v20  ;;  %736 = vmatpush.msra.mxu2 %v576_v20 }
  0xe7   :  { %492 = vmatpush.msrb.mxu1 %v443_v21  ;;  %587 = vmatpush.msrb.mxu3 %v560_v27 }
  0xe8   :  { %v416_v56 = vpop.f32.mrf.mxu0 }
  0xe9   :  { %493 = vmatpush.msrb.mxu1 %v442_v22  ;;  %v417_v2 = vadd.f32 %v777_v33, %v416_v56  ;;  %v575_v22 = vld [vmem:[#allocation12 + $0xd8] sm:$0xff]  ;;  %v566_v56 = vld [vmem:[#allocation12 + $0x90] sm:$0xff] }
  0xea   :  { %617 = vmatpush.msra.mxu0 %v575_v22  ;;  %737 = vmatpush.msra.mxu2 %v575_v22 }
  0xeb   :  { %670 = vmatpush.msra.mxu1 %v1129_v23 }
  0xed   :  { %671 = vmatpush.msra.mxu1 %v1132_v24 }
  0xef   :  { %672 = vmatpush.msra.mxu1 %v1135_v25 }
  0xf0   :  { %v419_v6 = vpop.f32.mrf.mxu0 }
  0xf1   :  { %673 = vmatpush.msra.mxu1 %v1138_v26  ;;  %v420_v11 = vadd.f32 %v777_v33, %v419_v6  ;;  %v559_v33 = vld [vmem:[#allocation12 + $0x58] sm:$0xff] }
  0xf2   :  { %588 = vmatpush.msrb.mxu3 %v559_v33 }
  0xf3   :  { %674 = vmatpush.msra.mxu1 %v1141_v28 }
  0xf5   :  { %675 = vmatpush.msra.mxu1 %v1147_v31 }
  0xf7   :  { %676 = vmatpush.msra.mxu1 %v1149_v32 }
  0xf9   :  { %677 = vmatpush.msra.mxu1 %v1155_v34 }
  0xfb   :  { %678 = vmatpush.msra.mxu1 %v1159_v39 }
  0xfd   :  { %679 = vmatpush.msra.mxu1 %v1161_v40 }
  0xff   :  { %680 = vmatpush.msra.mxu1 %v1164_v43 }
 0x101   :  { %681 = vmatpush.msra.mxu1 %v1167_v46 }
 0x103   :  { %682 = vmatpush.msra.mxu1 %v1175_v52 }
 0x105   :  { %683 = vmatpush.msra.mxu1 %v1177_v53 }
 0x107   :  { %684 = vmatpush.msra.mxu1 %v1180_v55 }
 0x109   :  { %685 = vmatpush.msra.mxu1 %v1183_v58 }
 0x142   :  { %v353_v29 = vpop.f32.mrf.mxu3 }
 0x14a   :  { %v324_v35 = vpop.f32.mrf.mxu2  ;;  %v356_v44 = vpop.f32.mrf.mxu3 }
 0x14b   :  { %v325_v36 = vadd.f32 %v776_v30, %v324_v35  ;;  %v573_v35 = vld [vmem:[#allocation12 + $0xc8] sm:$0xff] }
 0x14d   :  { %v354_v37 = vadd.f32 %v353_v29, %v325_v36  ;;  %v558_v36 = vld [vmem:[#allocation12 + $0x50] sm:$0xff] }
 0x14e   :  { %589 = vmatpush.msrb.mxu3 %v558_v36 }
 0x14f   :  { %v365_v42 = vmax.f32 %v354_v37, 0.0  ;;  %v572_v37 = vld [vmem:[#allocation12 + $0xc0] sm:$0xff] }
 0x151   :  { %v422_v45 = vadd.f32 %v411_v38, %v365_v42  ;;  %v557_v38 = vld [vmem:[#allocation12 + $0x48] sm:$0xff]  ;;  %v556_v42 = vld [vmem:[#allocation12 + $0x40] sm:$0xff] }
 0x152   :  { %v327_v47 = vpop.f32.mrf.mxu2  ;;  %v359_v59 = vpop.f32.mrf.mxu3  ;;  %590 = vmatpush.msrb.mxu3 %v557_v38 }
 0x153   :  { %v1170_v48 = vmax.f32 %v422_v45, 0.0  ;;  %v328_v49 = vadd.f32 %v776_v30, %v327_v47  ;;  %v570_v45 = vld [vmem:[#allocation12 + $0xb0] sm:$0xff]  ;;  %v569_v47 = vld [vmem:[#allocation12 + $0xa8] sm:$0xff] }
 0x154   :  { %591 = vmatpush.msrb.mxu3 %v556_v42 }
 0x155   :  { %434 = vst [vmem:[#allocation2 + $0x8] sm:$0xff] %v1170_v48  ;;  %v357_v50 = vadd.f32 %v356_v44, %v328_v49  ;;  %523 = vmatmul.f32.vlgmr.msrb.gmra.mxu2 %v1170_v48  ;;  %v568_v49 = vld [vmem:[#allocation12 + $0xa0] sm:$0xff] }
 0x157   :  { %v366_v54 = vmax.f32 %v357_v50, 0.0  ;;  %v555_v50 = vld [vmem:[#allocation12 + $0x38] sm:$0xff] }
 0x158   :  { %592 = vmatpush.msrb.mxu3 %v555_v50 }
 0x159   :  { %v423_v57 = vadd.f32 %v414_v51, %v366_v54  ;;  %v567_v51 = vld [vmem:[#allocation12 + $0x98] sm:$0xff]  ;;  %v554_v54 = vld [vmem:[#allocation12 + $0x30] sm:$0xff] }
 0x15a   :  { %v330_v60 = vpop.f32.mrf.mxu2  ;;  %v362_v9 = vpop.f32.mrf.mxu3  ;;  %593 = vmatpush.msrb.mxu3 %v554_v54 }
 0x15b   :  { %v331_v61 = vadd.f32 %v776_v30, %v330_v60  ;;  %v1186_v62 = vmax.f32 %v423_v57, 0.0  ;;  %v553_v57 = vld [vmem:[#allocation12 + $0x28] sm:$0xff]  ;;  %v564_v60 = vld [vmem:[#allocation12 + $0x80] sm:$0xff] }
 0x15c   :  { %v438_v63 = vld [vmem:[#allocation2 + $0x6] sm:$0xff]  ;;  %594 = vmatpush.msrb.mxu3 %v553_v57 }
 0x15d   :  { %v360_v1 = vadd.f32 %v359_v59, %v331_v61  ;;  %494 = vmatmul.f32.vlgmr.msrb.gmra.mxu1 %v438_v63  ;;  %435 = vst [vmem:[#allocation2 + $0x10] sm:$0xff] %v1186_v62  ;;  %526 = vmatmul.f32.gmra.mxu2 %v1186_v62  ;;  %v565_v59 = vld [vmem:[#allocation12 + $0x88] sm:$0xff]  ;;  %v551_v61 = vld [vmem:[#allocation12 + $0x18] sm:$0xff] }
 0x15e   :  { %v549_v63 = vld [vmem:[#allocation12 + $0x8] sm:$0xff] }
 0x15f   :  { %v367_v3 = vmax.f32 %v360_v1, 0.0  ;;  %v548_v1 = vld [vmem:[#allocation12] sm:$0xff] }
 0x161   :  { %v424_v4 = vadd.f32 %v417_v2, %v367_v3  ;;  %v778_v2 = vld [vmem:[%s1242_s8] ss:$0 sm:$0xff] }
 0x162   :  { %v333_v5 = vpop.f32.mrf.mxu2 }
 0x163   :  { %v334_v7 = vadd.f32 %v776_v30, %v333_v5  ;;  %v1191_v8 = vmax.f32 %v424_v4, 0.0  ;;  %v574_v30 = vld [vmem:[#allocation12 + $0xd0] sm:$0xff] }
 0x164   :  { %v439_v0 = vld [vmem:[#allocation2 + $0xe] sm:$0xff]  ;;  %618 = vmatpush.msra.mxu0 %v574_v30  ;;  %738 = vmatpush.msra.mxu2 %v574_v30 }
 0x165   :  { %v363_v10 = vadd.f32 %v362_v9, %v334_v7  ;;  %497 = vmatmul.f32.gmra.mxu1 %v439_v0  ;;  %436 = vst [vmem:[#allocation2 + $0x20] sm:$0xff] %v1191_v8  ;;  %529 = vmatmul.f32.gmra.mxu2 %v1191_v8 }
 0x166   :  { %619 = vmatpush.msra.mxu0 %v573_v35  ;;  %739 = vmatpush.msra.mxu2 %v573_v35 }
 0x167   :  { %v368_v15 = vmax.f32 %v363_v10, 0.0 }
 0x168   :  { %620 = vmatpush.msra.mxu0 %v572_v37  ;;  %740 = vmatpush.msra.mxu2 %v572_v37 }
 0x169   :  { %v425_v19 = vadd.f32 %v420_v11, %v368_v15  ;;  %v780_v11 = vld [vmem:[%s1244_s10] ss:$0 sm:$0xff]  ;;  %s968_s10 = smov [#allocation15]  }
 0x16a   :  { %621 = vmatpush.msra.mxu0 %v571_v41  ;;  %741 = vmatpush.msra.mxu2 %v571_v41  ;;  %v779_v15 = vld [vmem:[%s1246_s12] ss:$0 sm:$0xff]  ;;  %s715_s12 = sshll.u32 %s968_s10, 4  ;;  %s716_s12 = int_to_ptr.vmem [resolvable:$true] %s715_s12 }
 0x16b   :  { %v1195_v21 = vmax.f32 %v425_v19, 0.0 }
 0x16c   :  { %v440_v29 = vld [vmem:[#allocation2 + $0x1e] sm:$0xff]  ;;  %622 = vmatpush.msra.mxu0 %v570_v45  ;;  %742 = vmatpush.msra.mxu2 %v570_v45 }
 0x16d   :  { %500 = vmatmul.f32.gmra.mxu1 %v440_v29  ;;  %437 = vst [vmem:[#allocation2 + $0x28] sm:$0xff] %v1195_v21  ;;  %532 = vmatmul.f32.gmra.mxu2 %v1195_v21 }
 0x16e   :  { %623 = vmatpush.msra.mxu0 %v569_v47  ;;  %743 = vmatpush.msra.mxu2 %v569_v47 }
 0x170   :  { %624 = vmatpush.msra.mxu0 %v568_v49  ;;  %744 = vmatpush.msra.mxu2 %v568_v49 }
 0x172   :  { %625 = vmatpush.msra.mxu0 %v567_v51  ;;  %745 = vmatpush.msra.mxu2 %v567_v51 }
 0x174   :  { %v441_v44 = vld [vmem:[#allocation2 + $0x26] sm:$0xff]  ;;  %626 = vmatpush.msra.mxu0 %v566_v56  ;;  %746 = vmatpush.msra.mxu2 %v566_v56 }
 0x175   :  { %503 = vmatmul.f32.gmra.mxu1 %v441_v44 }
 0x176   :  { %627 = vmatpush.msra.mxu0 %v565_v59  ;;  %747 = vmatpush.msra.mxu2 %v565_v59 }
 0x178   :  { %628 = vmatpush.msra.mxu0 %v564_v60  ;;  %748 = vmatpush.msra.mxu2 %v564_v60 }
 0x17d   :  { %686 = vmatmul.f32.vlgmr.msra.gmra.mxu1 %v1170_v48  ;;  %v552_v48 = vld [vmem:[#allocation12 + $0x20] sm:$0xff] }
 0x17e   :  { %595 = vmatpush.msrb.mxu3 %v552_v48 }
 0x180   :  { %596 = vmatpush.msrb.mxu3 %v551_v61 }
 0x185   :  { %689 = vmatmul.f32.gmra.mxu1 %v1186_v62  ;;  %v550_v62 = vld [vmem:[#allocation12 + $0x10] sm:$0xff] }
 0x186   :  { %597 = vmatpush.msrb.mxu3 %v550_v62 }
 0x188   :  { %598 = vmatpush.msrb.mxu3 %v549_v63 }
 0x18a   :  { %599 = vmatpush.msrb.mxu3 %v548_v1 }
 0x18c   :  { %749 = vmatpush.msra.mxu3 %v1129_v23 }
 0x18e   :  { %750 = vmatpush.msra.mxu3 %v1132_v24 }
 0x190   :  { %751 = vmatpush.msra.mxu3 %v1135_v25 }
 0x192   :  { %752 = vmatpush.msra.mxu3 %v1138_v26 }
 0x194   :  { %753 = vmatpush.msra.mxu3 %v1141_v28 }
 0x196   :  { %754 = vmatpush.msra.mxu3 %v1147_v31 }
 0x198   :  { %755 = vmatpush.msra.mxu3 %v1149_v32 }
 0x19a   :  { %756 = vmatpush.msra.mxu3 %v1155_v34 }
 0x19c   :  { %757 = vmatpush.msra.mxu3 %v1159_v39 }
 0x19e   :  { %758 = vmatpush.msra.mxu3 %v1161_v40 }
 0x1a0   :  { %759 = vmatpush.msra.mxu3 %v1164_v43 }
 0x1a2   :  { %760 = vmatpush.msra.mxu3 %v1167_v46 }
 0x1a4   :  { %761 = vmatpush.msra.mxu3 %v1175_v52 }
 0x1a6   :  { %762 = vmatpush.msra.mxu3 %v1177_v53 }
 0x1a8   :  { %763 = vmatpush.msra.mxu3 %v1180_v55 }
 0x1aa   :  { %764 = vmatpush.msra.mxu3 %v1183_v58 }
 0x1d8   :  { %v524_v3 = vpop.f32.mrf.mxu2 }
 0x1da   :  { %v495_v23 = vpop.f32.mrf.mxu1 }
 0x1db   :  { %v496_v24 = vadd.f32 %v778_v2, %v495_v23 }
 0x1dd   :  { %v525_v25 = vadd.f32 %v524_v3, %v496_v24 }
 0x1df   :  { %v536_v26 = vmax.f32 %v525_v25, 0.0 }
 0x1e0   :  { %v527_v28 = vpop.f32.mrf.mxu2 }
 0x1e1   :  { %540 = vst [vmem:[#allocation3 + $0x8] sm:$0xff] %v536_v26  ;;  %629 = vmatmul.f32.vlgmr.msra.gmra.mxu0 %v536_v26 }
 0x1e2   :  { %v498_v31 = vpop.f32.mrf.mxu1 }
 0x1e3   :  { %v499_v32 = vadd.f32 %v778_v2, %v498_v31 }
 0x1e5   :  { %v528_v34 = vadd.f32 %v527_v28, %v499_v32 }
 0x1e7   :  { %v537_v39 = vmax.f32 %v528_v34, 0.0 }
 0x1e8   :  { %v544_v40 = vld [vmem:[#allocation3 + $0x6] sm:$0xff]  ;;  %v530_v43 = vpop.f32.mrf.mxu2 }
 0x1e9   :  { %600 = vmatmul.f32.vlgmr.msrb.gmra.mxu3 %v544_v40  ;;  %541 = vst [vmem:[#allocation3 + $0x10] sm:$0xff] %v537_v39  ;;  %632 = vmatmul.f32.gmra.mxu0 %v537_v39 }
 0x1ea   :  { %v501_v46 = vpop.f32.mrf.mxu1 }
 0x1eb   :  { %v502_v4 = vadd.f32 %v778_v2, %v501_v46 }
 0x1ed   :  { %v531_v5 = vadd.f32 %v530_v43, %v502_v4 }
 0x1ef   :  { %v538_v6 = vmax.f32 %v531_v5, 0.0 }
 0x1f0   :  { %v545_v52 = vld [vmem:[#allocation3 + $0xe] sm:$0xff]  ;;  %v533_v9 = vpop.f32.mrf.mxu2 }
 0x1f1   :  { %542 = vst [vmem:[#allocation3 + $0x20] sm:$0xff] %v538_v6  ;;  %603 = vmatmul.f32.gmra.mxu3 %v545_v52  ;;  %635 = vmatmul.f32.vlgmr.msra.gmra.mxu2 %v538_v6 }
 0x1f2   :  { %v504_v53 = vpop.f32.mrf.mxu1 }
 0x1f3   :  { %v505_v7 = vadd.f32 %v778_v2, %v504_v53 }
 0x1f5   :  { %v534_v55 = vadd.f32 %v533_v9, %v505_v7 }
 0x1f7   :  { %v539_v0 = vmax.f32 %v534_v55, 0.0 }
 0x1f8   :  { %v546_v10 = vld [vmem:[#allocation3 + $0x1e] sm:$0xff] }
 0x1f9   :  { %606 = vmatmul.f32.gmra.mxu3 %v546_v10  ;;  %543 = vst [vmem:[#allocation3 + $0x28] sm:$0xff] %v539_v0  ;;  %638 = vmatmul.f32.gmra.mxu2 %v539_v0 }
 0x1fa   :  { %v687_v12 = vpop.f32.mrf.mxu1 }
 0x1fb   :  { %v688_v18 = vadd.f32 %v779_v15, %v687_v12 }
 0x200   :  { %v547_v58 = vld [vmem:[#allocation3 + $0x26] sm:$0xff] }
 0x201   :  { %609 = vmatmul.f32.gmra.mxu3 %v547_v58 }
 0x209   :  { %692 = vmatmul.f32.vlgmr.msra.gmra.mxu3 %v1191_v8 }
 0x211   :  { %695 = vmatmul.f32.gmra.mxu3 %v1195_v21  ;;  %v690_v21 = vpop.f32.mrf.mxu1 }
 0x212   :  { %v691_v33 = vadd.f32 %v779_v15, %v690_v21 }
 0x25e   :  { %v630_v13 = vpop.f32.mrf.mxu0 }
 0x266   :  { %v633_v29 = vpop.f32.mrf.mxu0 }
 0x26c   :  { %v601_v14 = vpop.f32.mrf.mxu3 }
 0x26d   :  { %v602_v16 = vadd.f32 %v780_v11, %v601_v14 }
 0x26f   :  { %v631_v17 = vadd.f32 %v630_v13, %v602_v16 }
 0x271   :  { %v642_v19 = vmax.f32 %v631_v17, 0.0 }
 0x273   :  { %v699_v20 = vadd.f32 %v688_v18, %v642_v19 }
 0x274   :  { %v604_v22 = vpop.f32.mrf.mxu3  ;;  %v636_v44 = vpop.f32.mrf.mxu2 }
 0x275   :  { %v703_v8 = vmax.f32 %v699_v20, 0.0  ;;  %v605_v27 = vadd.f32 %v780_v11, %v604_v22 }
 0x277   :  { %707 = vst [vmem:[#allocation15] sm:$0xff] %v703_v8  ;;  %v634_v30 = vadd.f32 %v633_v29, %v605_v27 }
 0x279   :  { %v643_v35 = vmax.f32 %v634_v30, 0.0 }
 0x27b   :  { %v700_v36 = vadd.f32 %v691_v33, %v643_v35 }
 0x27c   :  { %v607_v37 = vpop.f32.mrf.mxu3  ;;  %v639_v56 = vpop.f32.mrf.mxu2 }
 0x27d   :  { %v704_v38 = vmax.f32 %v700_v36, 0.0  ;;  %v608_v42 = vadd.f32 %v780_v11, %v607_v37 }
 0x27f   :  { %708 = vst [vmem:[#allocation15 + $0x8] sm:$0xff] %v704_v38  ;;  %v637_v45 = vadd.f32 %v636_v44, %v608_v42 }
 0x281   :  { %v644_v49 = vmax.f32 %v637_v45, 0.0 }
 0x284   :  { %v610_v41 = vpop.f32.mrf.mxu3 }
 0x285   :  { %v611_v50 = vadd.f32 %v780_v11, %v610_v41 }
 0x287   :  { %v640_v57 = vadd.f32 %v639_v56, %v611_v50 }
 0x289   :  { %v645_v60 = vmax.f32 %v640_v57, 0.0 }
 0x28c   :  { %v693_v47 = vpop.f32.mrf.mxu3 }
 0x28d   :  { %v694_v51 = vadd.f32 %v779_v15, %v693_v47 }
 0x28f   :  { %v701_v54 = vadd.f32 %v694_v51, %v644_v49 }
 0x291   :  { %v705_v59 = vmax.f32 %v701_v54, 0.0 }
 0x293   :  { %709 = vst [vmem:[#allocation15 + $0x10] sm:$0xff] %v705_v59 }
 0x294   :  { %v696_v48 = vpop.f32.mrf.mxu3 }
 0x295   :  { %v697_v61 = vadd.f32 %v779_v15, %v696_v48 }
 0x297   :  { %v702_v62 = vadd.f32 %v697_v61, %v645_v60 }
 0x299   :  { %v706_v63 = vmax.f32 %v702_v62, 0.0 }
 0x29b   :  { %710 = vst [vmem:[#allocation15 + $0x18] sm:$0xff] %v706_v63 }
 0x29c   :  { %723 = dma.vmem_to_hbm [thread:$0]  %s716_s12, 512, %s718_s15, [#allocation6], %s960_s16, %s960_s16, %s961_s17  }
 0x29d   :  { %957 = dma.done.wait [#allocation6], 512  }
 0x29e   :  { %958 = vsyncadd [#allocation6], 4294966784 }
 0x29f   :  { %728 = vsyncpa [#allocation5], 1 }
 0x2a0   :  { %729 = vsyncpa [#allocation8], 1 }
 0x2a1   :  { %730 = vsyncpa [#allocation11], 1 }
 0x2a2   :  { %731 = vsyncpa [#allocation14], 1 }
 0x2a3   :  { %732 = vsyncpa [#allocation6], 1 }

</bundles_post_ra>
